<compile_context>
chip_gen: v6e
topology: v6e:2x2x1
jax: 0.10.0
libtpu: 0.0.40
codegen_flags: <defaults>
</compile_context>

<pallas_src>
import numpy as np
import jax
import jax.numpy as jnp
from jax.experimental import pallas as pl
from jax.experimental.pallas import tpu as pltpu

LATENT = 128          # args.latent_size
TCN_IN = 128          # self.tcn_fc = nn.Linear(128, latent_size)
BN_EPS = 1e-5
_TILE_J = 128         # source tile: lane dim of the mask block must be a 128-multiple
_ROW_TILE = 128       # projection-kernel row tile
_VMEM_LIMIT = 40 * 1024 * 1024  # > v5e 16 MiB scoped default, < v7x 64 MiB physical


# -----------------------------------------------------------------------------
# Small helpers
# -----------------------------------------------------------------------------
def _round_up(n, m):
    return ((n + m - 1) // m) * m


def _default_pair_dtype():
    """bf16 pairwise math where the VPU/EUP support it (v6e / v7x), else f32 (v5e & older)."""
    try:
        kind = jax.devices()[0].device_kind.lower()
    except Exception:
        return jnp.float32
    if any(tag in kind for tag in ("v6", "v7", "7x")):
        return jnp.bfloat16
    return jnp.float32


def _tile_i(pair_dtype):
    # f32 pair blocks are 2x larger per element -> halve the target tile (v5e-friendly).
    return 128 if pair_dtype == jnp.bfloat16 else 64


def _pad_rows(a, npad):
    a = jnp.asarray(a, jnp.float32)
    if a.shape[0] == npad:
        return a
    return jnp.pad(a, ((0, npad - a.shape[0]), (0, 0)))


# -----------------------------------------------------------------------------
# Kernels
# -----------------------------------------------------------------------------
def _proj_tcn_kernel(g_ref, t_ref, wt_ref, bt_ref, w_ref, add_ref, x_ref, p_ref):
    # x = gnn_in + tcn_fc(tcn_features)        (tcn add fused into this kernel)
    x = (g_ref[...]
         + jnp.dot(t_ref[...], wt_ref[...], preferred_element_type=jnp.float32)
         + bt_ref[...])
    x_ref[...] = x
    # Fused projection: [fi | si | fj | sj] = x @ [Wfi | Wsi | Wfj | Wsj] + add
    p_ref[...] = (jnp.dot(x, w_ref[...], preferred_element_type=jnp.float32)
                  + add_ref[...])


def _proj_kernel(x_ref, w_ref, add_ref, p_ref):
    p_ref[...] = (jnp.dot(x_ref[...], w_ref[...], preferred_element_type=jnp.float32)
                  + add_ref[...])


def _cgconv_pair_kernel(active_ref,                        # scalar-prefetch (SMEM): per-tile edge flags
                        mask_ref, pi_ref, pj_ref, x_ref,   # tiled VMEM inputs
                        scale_ref, shift_ref,              # folded-BN vectors (resident)
                        o_ref,                             # tiled output (TI, C)
                        acc_ref):                          # f32 (TI, C) accumulator scratch
    i = pl.program_id(0)
    j = pl.program_id(1)

    @pl.when(j == 0)
    def _init():
        acc_ref[...] = jnp.zeros_like(acc_ref)

    # Skip pair tiles with no edges (block-diagonal per-sample graph / padding).
    @pl.when(active_ref[i, j] > 0)
    def _compute():
        cdt = mask_ref.dtype                       # pairwise compute dtype (bf16 or f32)
        c = acc_ref.shape[1]
        pi = pi_ref[...].astype(cdt)               # (TI, 2C) = [fi | si]  (target side)
        pj = pj_ref[...].astype(cdt)               # (TJ, 2C) = [fj | sj]  (source side)
        fi, si = pi[:, :c], pi[:, c:]
        fj, sj = pj[:, :c], pj[:, c:]
        f = fi[:, None, :] + fj[None, :, :]        # (TI, TJ, C): axis0 target i, axis1 source j
        s = si[:, None, :] + sj[None, :, :]
        gate = jax.nn.sigmoid(f)
        # softplus matching torch.nn.functional.softplus (beta=1, threshold=20)
        sp = jnp.where(s > 20.0, s, jnp.log1p(jnp.exp(jnp.minimum(s, 20.0))))
        msg = gate * sp * mask_ref[...][:, :, None]
        acc_ref[...] += jnp.sum(msg, axis=1, dtype=jnp.float32)

    @pl.when(j == pl.num_programs(1) - 1)
    def _finalize():
        # BatchNorm (eval mode, folded) + residual + ReLU
        out = acc_ref[...] * scale_ref[...] + shift_ref[...] + x_ref[...]
        o_ref[...] = jnp.maximum(out, 0.0)


# -----------------------------------------------------------------------------
# pallas_call wrappers
# -----------------------------------------------------------------------------
def _fused_projection_with_tcn(g, t, wt, bt, w_all, add, rt=_ROW_TILE):
    npad, c = g.shape
    tin = t.shape[1]
    c4 = w_all.shape[1]
    return pl.pallas_call(
        _proj_tcn_kernel,
        out_shape=(jax.ShapeDtypeStruct((npad, c), jnp.float32),
                   jax.ShapeDtypeStruct((npad, c4), jnp.float32)),
        grid=(npad // rt,),
        in_specs=[
            pl.BlockSpec((rt, c), lambda i: (i, 0)),
            pl.BlockSpec((rt, tin), lambda i: (i, 0)),
            pl.BlockSpec((tin, c), lambda i: (0, 0)),
            pl.BlockSpec((1, c), lambda i: (0, 0)),
            pl.BlockSpec((c, c4), lambda i: (0, 0)),
            pl.BlockSpec((rt, c4), lambda i: (i, 0)),
        ],
        out_specs=(pl.BlockSpec((rt, c), lambda i: (i, 0)),
                   pl.BlockSpec((rt, c4), lambda i: (i, 0))),
        compiler_params=pltpu.CompilerParams(dimension_semantics=("parallel",)),
    )(g, t, wt, bt, w_all, add)


def _fused_projection(x, w_all, add, rt=_ROW_TILE):
    npad, c = x.shape
    c4 = w_all.shape[1]
    return pl.pallas_call(
        _proj_kernel,
        out_shape=jax.ShapeDtypeStruct((npad, c4), jnp.float32),
        grid=(npad // rt,),
        in_specs=[
            pl.BlockSpec((rt, c), lambda i: (i, 0)),
            pl.BlockSpec((c, c4), lambda i: (0, 0)),
            pl.BlockSpec((rt, c4), lambda i: (i, 0)),
        ],
        out_specs=pl.BlockSpec((rt, c4), lambda i: (i, 0)),
        compiler_params=pltpu.CompilerParams(dimension_semantics=("parallel",)),
    )(x, w_all, add)


def _cgconv_aggregate(active, mask, proj, x, scale, shift, ti, tj):
    npad, c = x.shape
    gi, gj = npad // ti, npad // tj
    msize = mask.dtype.itemsize
    cost = pl.CostEstimate(
        flops=int(6 * npad * npad * c),
        transcendentals=int(3 * npad * npad * c),
        bytes_accessed=int(npad * npad * msize
                           + (gi + gj) * npad * 2 * c * 4
                           + 2 * npad * c * 4),
    )
    return pl.pallas_call(
        _cgconv_pair_kernel,
        out_shape=jax.ShapeDtypeStruct((npad, c), jnp.float32),
        grid_spec=pltpu.PrefetchScalarGridSpec(
            num_scalar_prefetch=1,
            grid=(gi, gj),
            in_specs=[
                pl.BlockSpec((ti, tj), lambda i, j, act: (i, j)),      # mask tile
                pl.BlockSpec((ti, 2 * c), lambda i, j, act: (i, 0)),   # [fi|si] rows i
                pl.BlockSpec((tj, 2 * c), lambda i, j, act: (j, 1)),   # [fj|sj] rows j
                pl.BlockSpec((ti, c), lambda i, j, act: (i, 0)),       # residual x
                pl.BlockSpec((1, c), lambda i, j, act: (0, 0)),        # BN scale
                pl.BlockSpec((1, c), lambda i, j, act: (0, 0)),        # BN shift
            ],
            out_specs=pl.BlockSpec((ti, c), lambda i, j, act: (i, 0)),
            scratch_shapes=[pltpu.VMEM((ti, c), jnp.float32)],
        ),
        compiler_params=pltpu.CompilerParams(
            dimension_semantics=("parallel", "arbitrary"),
            vmem_limit_bytes=_VMEM_LIMIT,
        ),
        cost_estimate=cost,
    )(active, mask, proj, proj, x, scale, shift)


# -----------------------------------------------------------------------------
# Parameter packing / glue
# -----------------------------------------------------------------------------
def _pack_cgconv(p, centers_pad):
    # Fused (C, 4C) weight so all four per-node projections run as one MXU pass.
    # The K=2 centers matmuls stay in plain XLA (never fed to the MXU), folded
    # together with the biases into a per-node additive term:
    #   proj = x @ [Wfi|Wsi|Wfj|Wsj] + [cf+bf, cs+bs, -cf, -cs]
    w_all = jnp.concatenate([p["wfi"], p["wsi"], p["wfj"], p["wsj"]], axis=1)
    cf = centers_pad @ p["wfe"]
    cs = centers_pad @ p["wse"]
    add = jnp.concatenate([cf + p["bf"], cs + p["bs"], -cf, -cs], axis=1)
    return w_all, add


def _build_mask_and_active(agents_per_sample, npad, ti, tj, dtype):
    # Host-side glue equivalent of build_fully_connected_edge_idx: fully
    # connected per sample, no self loops, block-diagonal.  mask[i, j] = edge j -> i.
    # TODO(synk): make this jit-traceable over variable agent counts by shipping
    #             per-sample offsets as device-side scalar-prefetch metadata.
    n = int(sum(agents_per_sample))
    sid = np.concatenate([np.full(int(m), k, dtype=np.int64)
                          for k, m in enumerate(agents_per_sample)])
    blk = (sid[:, None] == sid[None, :]).astype(np.float32)
    np.fill_diagonal(blk, 0.0)
    mask = np.zeros((npad, npad), dtype=np.float32)
    mask[:n, :n] = blk
    active = mask.reshape(npad // ti, ti, npad // tj, tj).any(axis=(1, 3))
    return jnp.asarray(mask, dtype=dtype), jnp.asarray(active.astype(np.int32))


def init_cgconv_params(key, c):
    ks = jax.random.split(key, 6)
    fan_in = 2 * c + 2
    lim = 1.0 / np.sqrt(fan_in)

    def u(k, shape):
        return jax.random.uniform(k, shape, jnp.float32, -lim, lim)

    # BatchNorm1d eval-mode fold with default stats (gamma=1, beta=0, mean=0, var=1).
    # TODO(synk): fold trained running stats / affine params into scale & shift.
    scale = jnp.full((1, c), 1.0 / np.sqrt(1.0 + BN_EPS), jnp.float32)
    shift = jnp.zeros((1, c), jnp.float32)
    return {"wfi": u(ks[0], (c, c)), "wfj": u(ks[1], (c, c)), "wfe": u(ks[2], (2, c)),
            "bf": u(ks[3], (1, c)),
            "wsi": u(ks[4], (c, c)), "wsj": u(ks[5], (c, c)),
            "wse": u(jax.random.fold_in(key, 7), (2, c)),
            "bs": u(jax.random.fold_in(key, 8), (1, c)),
            "scale": scale, "shift": shift}


def init_params(key, c):
    k_tcn, k_g1, k_g2 = jax.random.split(key, 3)
    lim = 1.0 / np.sqrt(TCN_IN)
    w_tcn = jax.random.uniform(k_tcn, (TCN_IN, c), jnp.float32, -lim, lim)
    b_tcn = jax.random.uniform(jax.random.fold_in(k_tcn, 1), (1, c),
                               jnp.float32, -lim, lim)
    return {"w_tcn": w_tcn, "b_tcn": b_tcn,
            "gcn1": init_cgconv_params(k_g1, c),
            "gcn2": init_cgconv_params(k_g2, c)}


# -----------------------------------------------------------------------------
# Forward
# -----------------------------------------------------------------------------
def agent_gnn_forward(params, gnn_in, centers, agents_per_sample,
                      tcn_features=None, pair_dtype=None):
    n, c = gnn_in.shape
    if pair_dtype is None:
        pair_dtype = _default_pair_dtype()
    ti, tj = _tile_i(pair_dtype), _TILE_J
    npad = _round_up(max(n, 1), max(ti, tj))   # pad nodes so every tile is full

    mask, active = _build_mask_and_active(agents_per_sample, npad, ti, tj, pair_dtype)
    x = _pad_rows(gnn_in, npad)
    centers_pad = _pad_rows(centers, npad)

    # ---- layer 1: (tcn add +) fused projection, then tiled pairwise aggregation ----
    w1, a1 = _pack_cgconv(params["gcn1"], centers_pad)
    if tcn_features is not None:
        t = _pad_rows(tcn_features, npad)
        x, p1 = _fused_projection_with_tcn(x, t, params["w_tcn"], params["b_tcn"], w1, a1)
    else:
        p1 = _fused_projection(x, w1, a1)
    x = _cgconv_aggregate(active, mask, p1, x,
                          params["gcn1"]["scale"], params["gcn1"]["shift"], ti, tj)

    # ---- layer 2 ----
    # TODO(synk): a per-sample-fused variant could keep the layer-1 output VMEM-resident.
    w2, a2 = _pack_cgconv(params["gcn2"], centers_pad)
    p2 = _fused_projection(x, w2, a2)
    x = _cgconv_aggregate(active, mask, p2, x,
                          params["gcn2"]["scale"], params["gcn2"]["shift"], ti, tj)

    return x[:n]


# -----------------------------------------------------------------------------
if __name__ == "__main__":
    key = jax.random.PRNGKey(0)
    k_p, k_x, k_c, k_t = jax.random.split(key, 4)

    agents_per_sample = [3, 5]          # two samples, 8 nodes total
    n = sum(agents_per_sample)
    c = LATENT

    gnn_in = jax.random.normal(k_x, (n, c), jnp.float32)
    centers = jax.random.normal(k_c, (n, 2), jnp.float32)
    tcn_features = jax.random.normal(k_t, (n, TCN_IN), jnp.float32)
    params = init_params(k_p, c)

    try:
        out = jax.block_until_ready(
            agent_gnn_forward(params, gnn_in, centers, agents_per_sample, tcn_features))
    except Exception:
        # Conservative fallback: f32 pairwise math (e.g. if bf16 lowering is not
        # available on this chip generation).
        out = jax.block_until_ready(
            agent_gnn_forward(params, gnn_in, centers, agents_per_sample, tcn_features,
                              pair_dtype=jnp.float32))

    assert out.shape == (n, c) and out.dtype == jnp.float32
    assert bool(jnp.all(jnp.isfinite(out)))
    print("KERNEL_OK")
</pallas_src>

<mosaic_0001>
module attributes {stable_mosaic.version = 11 : i64} {
  func.func @_proj_tcn_kernel(%arg0: i32, %arg1: memref<128x128xf32, #tpu.memory_space<vmem>>, %arg2: memref<128x128xf32, #tpu.memory_space<vmem>>, %arg3: memref<128x128xf32, #tpu.memory_space<vmem>>, %arg4: memref<1x128xf32, #tpu.memory_space<vmem>>, %arg5: memref<128x512xf32, #tpu.memory_space<vmem>>, %arg6: memref<128x512xf32, #tpu.memory_space<vmem>>, %arg7: memref<128x128xf32, #tpu.memory_space<vmem>>, %arg8: memref<128x512xf32, #tpu.memory_space<vmem>>) attributes {dimension_semantics = [#tpu.dimension_semantics<parallel>], iteration_bounds = array<i64: 1>, scalar_prefetch = 0 : i64, scratch_operands = 0 : i64, tpu.core_type = #tpu.core_type<tc>, window_params = [{transform_indices = @transform_0, window_bounds = array<i64: 128, 128>}, {transform_indices = @transform_1, window_bounds = array<i64: 128, 128>}, {pipeline_mode = #tpu.pipeline_mode<synchronous>, transform_indices = @transform_2, window_bounds = array<i64: 128, 128>}, {pipeline_mode = #tpu.pipeline_mode<synchronous>, transform_indices = @transform_3, window_bounds = array<i64: 1, 128>}, {pipeline_mode = #tpu.pipeline_mode<synchronous>, transform_indices = @transform_4, window_bounds = array<i64: 128, 512>}, {transform_indices = @transform_5, window_bounds = array<i64: 128, 512>}, {transform_indices = @transform_6, window_bounds = array<i64: 128, 128>}, {transform_indices = @transform_7, window_bounds = array<i64: 128, 512>}]} {
    %c0 = arith.constant 0 : index
    %c0_0 = arith.constant 0 : index
    %0 = vector.load %arg1[%c0, %c0_0] : memref<128x128xf32, #tpu.memory_space<vmem>>, vector<128x128xf32>
    %c0_1 = arith.constant 0 : index
    %c0_2 = arith.constant 0 : index
    %1 = vector.load %arg2[%c0_1, %c0_2] : memref<128x128xf32, #tpu.memory_space<vmem>>, vector<128x128xf32>
    %c0_3 = arith.constant 0 : index
    %c0_4 = arith.constant 0 : index
    %2 = vector.load %arg3[%c0_3, %c0_4] : memref<128x128xf32, #tpu.memory_space<vmem>>, vector<128x128xf32>
    %cst = arith.constant dense<0.000000e+00> : vector<128x128xf32>
    %3 = tpu.matmul %1, %2, %cst {dimension_numbers = #tpu.dot_dimension_numbers<[1], [0], [0], [1], [0, 0, 1, 1], [], []>} : vector<128x128xf32>, vector<128x128xf32>, vector<128x128xf32> -> vector<128x128xf32>
    %4 = arith.addf %0, %3 : vector<128x128xf32>
    %c0_5 = arith.constant 0 : index
    %c0_6 = arith.constant 0 : index
    %5 = vector.load %arg4[%c0_5, %c0_6] : memref<1x128xf32, #tpu.memory_space<vmem>>, vector<1x128xf32>
    %6 = vector.broadcast %5 : vector<1x128xf32> to vector<128x128xf32>
    %7 = arith.addf %4, %6 : vector<128x128xf32>
    %c0_7 = arith.constant 0 : index
    %c0_8 = arith.constant 0 : index
    %8 = vector.load %arg7[%c0_7, %c0_8] : memref<128x128xf32, #tpu.memory_space<vmem>>, vector<128x128xf32>
    tpu.vector_store %arg7[%c0_7, %c0_8], %7 {strides = array<i32>} : memref<128x128xf32, #tpu.memory_space<vmem>>, vector<128x128xf32>,
    %c0_9 = arith.constant 0 : index
    %c0_10 = arith.constant 0 : index
    %9 = vector.load %arg5[%c0_9, %c0_10] : memref<128x512xf32, #tpu.memory_space<vmem>>, vector<128x512xf32>
    %cst_11 = arith.constant dense<0.000000e+00> : vector<128x512xf32>
    %10 = tpu.matmul %7, %9, %cst_11 {dimension_numbers = #tpu.dot_dimension_numbers<[1], [0], [0], [1], [0, 0, 1, 1], [], []>} : vector<128x128xf32>, vector<128x512xf32>, vector<128x512xf32> -> vector<128x512xf32>
    %c0_12 = arith.constant 0 : index
    %c0_13 = arith.constant 0 : index
    %11 = vector.load %arg6[%c0_12, %c0_13] : memref<128x512xf32, #tpu.memory_space<vmem>>, vector<128x512xf32>
    %12 = arith.addf %10, %11 : vector<128x512xf32>
    %c0_14 = arith.constant 0 : index
    %c0_15 = arith.constant 0 : index
    %13 = vector.load %arg8[%c0_14, %c0_15] : memref<128x512xf32, #tpu.memory_space<vmem>>, vector<128x512xf32>
    tpu.vector_store %arg8[%c0_14, %c0_15], %12 {strides = array<i32>} : memref<128x512xf32, #tpu.memory_space<vmem>>, vector<128x512xf32>,
    return
  }
  func.func @transform_0(%arg0: i32) -> (i32, i32) {
    %c0_i32 = arith.constant 0 : i32
    %c0_i32_0 = arith.constant 0 : i32
    return %arg0, %c0_i32 : i32, i32
  }
  func.func @transform_1(%arg0: i32) -> (i32, i32) {
    %c0_i32 = arith.constant 0 : i32
    %c0_i32_0 = arith.constant 0 : i32
    return %arg0, %c0_i32 : i32, i32
  }
  func.func @transform_2(%arg0: i32) -> (i32, i32) {
    %c0_i32 = arith.constant 0 : i32
    %c0_i32_0 = arith.constant 0 : i32
    %c0_i32_1 = arith.constant 0 : i32
    return %c0_i32, %c0_i32_0 : i32, i32
  }
  func.func @transform_3(%arg0: i32) -> (i32, i32) {
    %c0_i32 = arith.constant 0 : i32
    %c0_i32_0 = arith.constant 0 : i32
    %c0_i32_1 = arith.constant 0 : i32
    return %c0_i32, %c0_i32_0 : i32, i32
  }
  func.func @transform_4(%arg0: i32) -> (i32, i32) {
    %c0_i32 = arith.constant 0 : i32
    %c0_i32_0 = arith.constant 0 : i32
    %c0_i32_1 = arith.constant 0 : i32
    return %c0_i32, %c0_i32_0 : i32, i32
  }
  func.func @transform_5(%arg0: i32) -> (i32, i32) {
    %c0_i32 = arith.constant 0 : i32
    %c0_i32_0 = arith.constant 0 : i32
    return %arg0, %c0_i32 : i32, i32
  }
  func.func @transform_6(%arg0: i32) -> (i32, i32) {
    %c0_i32 = arith.constant 0 : i32
    %c0_i32_0 = arith.constant 0 : i32
    return %arg0, %c0_i32 : i32, i32
  }
  func.func @transform_7(%arg0: i32) -> (i32, i32) {
    %c0_i32 = arith.constant 0 : i32
    %c0_i32_0 = arith.constant 0 : i32
    return %arg0, %c0_i32 : i32, i32
  }
}

module attributes {stable_mosaic.version = 11 : i64} {
  func.func @_proj_tcn_kernel(%arg0: i32, %arg1: memref<128x128xf32, #tpu.memory_space<vmem>>, %arg2: memref<128x128xf32, #tpu.memory_space<vmem>>, %arg3: memref<128x128xf32, #tpu.memory_space<vmem>>, %arg4: memref<1x128xf32, #tpu.memory_space<vmem>>, %arg5: memref<128x512xf32, #tpu.memory_space<vmem>>, %arg6: memref<128x512xf32, #tpu.memory_space<vmem>>, %arg7: memref<128x128xf32, #tpu.memory_space<vmem>>, %arg8: memref<128x512xf32, #tpu.memory_space<vmem>>) attributes {dimension_semantics = [#tpu.dimension_semantics<parallel>], iteration_bounds = array<i64: 1>, scalar_prefetch = 0 : i64, scratch_operands = 0 : i64, tpu.core_type = #tpu.core_type<tc>, window_params = [{transform_indices = @transform_0, window_bounds = array<i64: 128, 128>}, {transform_indices = @transform_1, window_bounds = array<i64: 128, 128>}, {pipeline_mode = #tpu.pipeline_mode<synchronous>, transform_indices = @transform_2, window_bounds = array<i64: 128, 128>}, {pipeline_mode = #tpu.pipeline_mode<synchronous>, transform_indices = @transform_3, window_bounds = array<i64: 1, 128>}, {pipeline_mode = #tpu.pipeline_mode<synchronous>, transform_indices = @transform_4, window_bounds = array<i64: 128, 512>}, {transform_indices = @transform_5, window_bounds = array<i64: 128, 512>}, {transform_indices = @transform_6, window_bounds = array<i64: 128, 128>}, {transform_indices = @transform_7, window_bounds = array<i64: 128, 512>}]} {
    %c0 = arith.constant 0 : index
    %c0_0 = arith.constant 0 : index
    %0 = vector.load %arg1[%c0, %c0_0] : memref<128x128xf32, #tpu.memory_space<vmem>>, vector<128x128xf32>
    %c0_1 = arith.constant 0 : index
    %c0_2 = arith.constant 0 : index
    %1 = vector.load %arg2[%c0_1, %c0_2] : memref<128x128xf32, #tpu.memory_space<vmem>>, vector<128x128xf32>
    %c0_3 = arith.constant 0 : index
    %c0_4 = arith.constant 0 : index
    %2 = vector.load %arg3[%c0_3, %c0_4] : memref<128x128xf32, #tpu.memory_space<vmem>>, vector<128x128xf32>
    %cst = arith.constant dense<0.000000e+00> : vector<128x128xf32>
    %3 = tpu.matmul %1, %2, %cst {dimension_numbers = #tpu.dot_dimension_numbers<[1], [0], [0], [1], [0, 0, 1, 1], [], []>} : vector<128x128xf32>, vector<128x128xf32>, vector<128x128xf32> -> vector<128x128xf32>
    %4 = arith.addf %0, %3 : vector<128x128xf32>
    %c0_5 = arith.constant 0 : index
    %c0_6 = arith.constant 0 : index
    %5 = vector.load %arg4[%c0_5, %c0_6] : memref<1x128xf32, #tpu.memory_space<vmem>>, vector<1x128xf32>
    %6 = vector.broadcast %5 : vector<1x128xf32> to vector<128x128xf32>
    %7 = arith.addf %4, %6 : vector<128x128xf32>
    %c0_7 = arith.constant 0 : index
    %c0_8 = arith.constant 0 : index
    %8 = vector.load %arg7[%c0_7, %c0_8] : memref<128x128xf32, #tpu.memory_space<vmem>>, vector<128x128xf32>
    tpu.vector_store %arg7[%c0_7, %c0_8], %7 {strides = array<i32>} : memref<128x128xf32, #tpu.memory_space<vmem>>, vector<128x128xf32>,
    %c0_9 = arith.constant 0 : index
    %c0_10 = arith.constant 0 : index
    %9 = vector.load %arg5[%c0_9, %c0_10] : memref<128x512xf32, #tpu.memory_space<vmem>>, vector<128x512xf32>
    %cst_11 = arith.constant dense<0.000000e+00> : vector<128x512xf32>
    %10 = tpu.matmul %7, %9, %cst_11 {dimension_numbers = #tpu.dot_dimension_numbers<[1], [0], [0], [1], [0, 0, 1, 1], [], []>} : vector<128x128xf32>, vector<128x512xf32>, vector<128x512xf32> -> vector<128x512xf32>
    %c0_12 = arith.constant 0 : index
    %c0_13 = arith.constant 0 : index
    %11 = vector.load %arg6[%c0_12, %c0_13] : memref<128x512xf32, #tpu.memory_space<vmem>>, vector<128x512xf32>
    %12 = arith.addf %10, %11 : vector<128x512xf32>
    %c0_14 = arith.constant 0 : index
    %c0_15 = arith.constant 0 : index
    %13 = vector.load %arg8[%c0_14, %c0_15] : memref<128x512xf32, #tpu.memory_space<vmem>>, vector<128x512xf32>
    tpu.vector_store %arg8[%c0_14, %c0_15], %12 {strides = array<i32>} : memref<128x512xf32, #tpu.memory_space<vmem>>, vector<128x512xf32>,
    return
  }
  func.func @transform_0(%arg0: i32) -> (i32, i32) {
    %c0_i32 = arith.constant 0 : i32
    %c0_i32_0 = arith.constant 0 : i32
    return %arg0, %c0_i32 : i32, i32
  }
  func.func @transform_1(%arg0: i32) -> (i32, i32) {
    %c0_i32 = arith.constant 0 : i32
    %c0_i32_0 = arith.constant 0 : i32
    return %arg0, %c0_i32 : i32, i32
  }
  func.func @transform_2(%arg0: i32) -> (i32, i32) {
    %c0_i32 = arith.constant 0 : i32
    %c0_i32_0 = arith.constant 0 : i32
    %c0_i32_1 = arith.constant 0 : i32
    return %c0_i32, %c0_i32_0 : i32, i32
  }
  func.func @transform_3(%arg0: i32) -> (i32, i32) {
    %c0_i32 = arith.constant 0 : i32
    %c0_i32_0 = arith.constant 0 : i32
    %c0_i32_1 = arith.constant 0 : i32
    return %c0_i32, %c0_i32_0 : i32, i32
  }
  func.func @transform_4(%arg0: i32) -> (i32, i32) {
    %c0_i32 = arith.constant 0 : i32
    %c0_i32_0 = arith.constant 0 : i32
    %c0_i32_1 = arith.constant 0 : i32
    return %c0_i32, %c0_i32_0 : i32, i32
  }
  func.func @transform_5(%arg0: i32) -> (i32, i32) {
    %c0_i32 = arith.constant 0 : i32
    %c0_i32_0 = arith.constant 0 : i32
    return %arg0, %c0_i32 : i32, i32
  }
  func.func @transform_6(%arg0: i32) -> (i32, i32) {
    %c0_i32 = arith.constant 0 : i32
    %c0_i32_0 = arith.constant 0 : i32
    return %arg0, %c0_i32 : i32, i32
  }
  func.func @transform_7(%arg0: i32) -> (i32, i32) {
    %c0_i32 = arith.constant 0 : i32
    %c0_i32_0 = arith.constant 0 : i32
    return %arg0, %c0_i32 : i32, i32
  }
}

</mosaic_0001>

<bundles_post_ra>
// kernel: tpu_custom_call.1
= control target key start
LH: loop header
LB: loop body
LE: loop exit
PB: predicated region body
PF: predicated region fallthrough
CT: control target
= control target key end

     0   :  { %13 = vsyncpa [#allocation3], 0  ;;  %s1470_s0 = inlined_call_operand.hbm [shape: f32[128,128], index: 0, kind: input, shape index: {}]   ;;  %s1471_s1 = inlined_call_operand.hbm [shape: f32[128,128], index: 1, kind: input, shape index: {}]   ;;  %s1472_s2 = inlined_call_operand.hbm [shape: f32[128,128], index: 2, kind: input, shape index: {}]   ;;  %s1473_s3 = inlined_call_operand.vmem [shape: f32[1,128], index: 3, kind: input, shape index: {}]   ;;  %s1474_s4 = inlined_call_operand.hbm [shape: f32[128,512], index: 4, kind: input, shape index: {}]   ;;  %s1475_s5 = inlined_call_operand.hbm [shape: f32[128,512], index: 5, kind: input, shape index: {}]   ;;  %s1476_s6 = inlined_call_operand.hbm [shape: f32[128,128], index: 6, kind: output, shape index: {0}]   ;;  %s1477_s7 = inlined_call_operand.hbm [shape: f32[128,512], index: 7, kind: output, shape index: {1}]  }
   0x1   :  { %14 = vsyncpa [#allocation6], 0 }
   0x2   :  { %15 = vsyncpa [#allocation9], 0 }
   0x3   :  { %16 = vsyncpa [#allocation4], 0 }
   0x4   :  { %17 = vsyncpa [#allocation13], 0  ;;  %s1175_s24 = smov [#allocation5]   ;;  %s1176_s26 = smov [#allocation8]  }
   0x5   :  { %s35_s25 = sshll.u32 %s1175_s24, 4  ;;  %s61_s27 = sshll.u32 %s1176_s26, 4  ;;  %s36_s25 = int_to_ptr.vmem [resolvable:$true] %s35_s25  ;;  %s62_s27 = int_to_ptr.vmem [resolvable:$true] %s61_s27 }
   0x6   :  { %s1033_s28 = scalar_lea.vmem %s36_s25, 2048  ;;  %p1038_p1 = scmp.lt.s32.totalorder %s36_s25, %s36_s25 }
   0x7   :  { %p1034_p0 = scmp.ne.s32.totalorder %s36_s25, %s1033_s28  ;;  %p1039_p2 = scmp.lt.s32.totalorder %s1033_s28, %s1033_s28 }
   0x9   :  { %p1040_p3 = por %p1039_p2, %p1038_p1 }
   0xb   :  { %p1041_p4 = pnand %p1040_p3, %p1034_p0 }
   0xd   :  { %1044 = shalt.err (!%p1041_p4)
}
   0xe   :  { %s1177_s29 = smov 128   ;;  %s1178_s30 = smov 8  }
   0xf   :  { %41 = dma.hbm_to_vmem [thread:$0]  %s1471_s1, 2048, %s36_s25, [#allocation6], %s1177_s29, %s1177_s29, %s1178_s30  }
  0x10   :  { %s1053_s10 = scalar_lea.vmem %s62_s27, 8192  ;;  %p1058_p6 = scmp.lt.s32.totalorder %s62_s27, %s62_s27 }
  0x11   :  { %p1054_p5 = scmp.ne.s32.totalorder %s62_s27, %s1053_s10  ;;  %p1059_p7 = scmp.lt.s32.totalorder %s1053_s10, %s1053_s10 }
  0x13   :  { %p1060_p8 = por %p1059_p7, %p1058_p6 }
  0x15   :  { %p1061_p9 = pnand %p1060_p8, %p1054_p5 }
  0x17   :  { %1064 = shalt.err (!%p1061_p9)
}
  0x18   :  { %s1179_s11 = smov 512   ;;  %s1180_s12 = smov 32  }
  0x19   :  { %67 = dma.hbm_to_vmem [thread:$0]  %s1474_s4, 8192, %s62_s27, [#allocation9], %s1179_s11, %s1179_s11, %s1180_s12  }
  0x1a   :  { %s1181_s15 = smov [#allocation2]   ;;  %s1182_s17 = smov [#allocation7]  }
  0x1b   :  { %s23_s16 = sshll.u32 %s1181_s15, 4  ;;  %s47_s1 = sshll.u32 %s1182_s17, 4  ;;  %s24_s16 = int_to_ptr.vmem [resolvable:$true] %s23_s16  ;;  %s48_s1 = int_to_ptr.vmem [resolvable:$true] %s47_s1 }
  0x1c   :  { %s1073_s18 = scalar_lea.vmem %s24_s16, 2048  ;;  %p1078_p11 = scmp.lt.s32.totalorder %s24_s16, %s24_s16 }
  0x1d   :  { %p1074_p10 = scmp.ne.s32.totalorder %s24_s16, %s1073_s18  ;;  %p1079_p12 = scmp.lt.s32.totalorder %s1073_s18, %s1073_s18 }
  0x1f   :  { %p1080_p13 = por %p1079_p12, %p1078_p11 }
  0x21   :  { %p1081_p0 = pnand %p1080_p13, %p1074_p10 }
  0x23   :  { %1084 = shalt.err (!%p1081_p0)
}
  0x24   :  { %29 = dma.hbm_to_vmem [thread:$0]  %s1470_s0, 2048, %s24_s16, [#allocation3], %s1177_s29, %s1177_s29, %s1178_s30  }
  0x25   :  { %s1093_s4 = scalar_lea.vmem %s48_s1, 2048  ;;  %p1098_p2 = scmp.lt.s32.totalorder %s48_s1, %s48_s1 }
  0x26   :  { %p1094_p1 = scmp.ne.s32.totalorder %s48_s1, %s1093_s4  ;;  %p1099_p3 = scmp.lt.s32.totalorder %s1093_s4, %s1093_s4 }
  0x28   :  { %p1100_p4 = por %p1099_p3, %p1098_p2 }
  0x2a   :  { %p1101_p5 = pnand %p1100_p4, %p1094_p1 }
  0x2c   :  { %1104 = shalt.err (!%p1101_p5)
}
  0x2d   :  { %53 = dma.hbm_to_vmem [thread:$0]  %s1472_s2, 2048, %s48_s1, [#allocation6], %s1177_s29, %s1177_s29, %s1178_s30  }
  0x2e   :  { %s1183_s23 = smov [#allocation10]  }
  0x2f   :  { %s73_s24 = sshll.u32 %s1183_s23, 4  ;;  %s74_s24 = int_to_ptr.vmem [resolvable:$true] %s73_s24 }
  0x30   :  { %s1113_s25 = scalar_lea.vmem %s74_s24, 8192  ;;  %p1118_p7 = scmp.lt.s32.totalorder %s74_s24, %s74_s24 }
  0x31   :  { %p1114_p6 = scmp.ne.s32.totalorder %s74_s24, %s1113_s25  ;;  %p1119_p8 = scmp.lt.s32.totalorder %s1113_s25, %s1113_s25 }
  0x33   :  { %p1120_p9 = por %p1119_p8, %p1118_p7 }
  0x35   :  { %p1121_p10 = pnand %p1120_p9, %p1114_p6 }
  0x37   :  { %1124 = shalt.err (!%p1121_p10)
}
  0x38   :  { %79 = dma.hbm_to_vmem [thread:$0]  %s1475_s5, 8192, %s74_s24, [#allocation9], %s1179_s11, %s1179_s11, %s1180_s12  }
  0x39   :  { %1165 = dma.done.wait [#allocation3], 2048  }
  0x3a   :  { %1166 = vsyncadd [#allocation3], 4294965248 }
  0x3b   :  { %1167 = dma.done.wait [#allocation6], 4096  }
  0x3c   :  { %1168 = vsyncadd [#allocation6], 4294963200 }
  0x3d   :  { %1169 = dma.done.wait [#allocation9], 16384  }
  0x3e   :  { %1170 = vsyncadd [#allocation9], 4294950912  ;;  %v142_v0 = vld [vmem:[#allocation7 + $0x78] sm:$0xff]  ;;  %v141_v1 = vld [vmem:[#allocation7 + $0x70] sm:$0xff] }
  0x3f   :  { %925 = vmatprep.subr.mxu0 %v142_v0  ;;  %v140_v2 = vld [vmem:[#allocation7 + $0x68] sm:$0xff]  ;;  %v139_v3 = vld [vmem:[#allocation7 + $0x60] sm:$0xff]  ;;  %v138_v5 = vld [vmem:[#allocation7 + $0x58] sm:$0xff] }
  0x40   :  { %926 = vmatpush3.msra.mxu0 %v142_v0  ;;  %v111_v4 = vld [vmem:[#allocation5] sm:$0xff]  ;;  %v137_v6 = vld [vmem:[#allocation7 + $0x50] sm:$0xff]  ;;  %v136_v7 = vld [vmem:[#allocation7 + $0x48] sm:$0xff] }
  0x41   :  { %927 = vmatprep.subr.mxu0 %v141_v1  ;;  %957 = vmatprep.mubr.f32.mxu0 %v111_v4  ;;  %v404_v8 = vld [vmem:[#allocation8 + $0x1e8] sm:$0xff]  ;;  %v403_v9 = vld [vmem:[#allocation8 + $0x1e0] sm:$0xff]  ;;  %v134_v15 = vld [vmem:[#allocation7 + $0x38] sm:$0xff] }
  0x42   :  { %928 = vmatpush3.msra.mxu0 %v141_v1  ;;  %471 = vmatprep.subr.mxu1 %v404_v8  ;;  %v400_v10 = vld [vmem:[#allocation8 + $0x1c8] sm:$0xff]  ;;  %v135_v11 = vld [vmem:[#allocation7 + $0x40] sm:$0xff]  ;;  %v133_v18 = vld [vmem:[#allocation7 + $0x30] sm:$0xff] }
  0x43   :  { %929 = vmatprep.subr.mxu0 %v140_v2  ;;  %472 = vmatpush1.msra.mxu1 %v403_v9  ;;  %v399_v12 = vld [vmem:[#allocation8 + $0x1c0] sm:$0xff]  ;;  %v396_v13 = vld [vmem:[#allocation8 + $0x1a8] sm:$0xff]  ;;  %v130_v27 = vld [vmem:[#allocation7 + $0x18] sm:$0xff] }
  0x44   :  { %930 = vmatpush3.msra.mxu0 %v140_v2  ;;  %473 = vmatprep.subr.mxu1 %v400_v10  ;;  %v395_v14 = vld [vmem:[#allocation8 + $0x1a0] sm:$0xff]  ;;  %v392_v16 = vld [vmem:[#allocation8 + $0x188] sm:$0xff]  ;;  %v129_v30 = vld [vmem:[#allocation7 + $0x10] sm:$0xff] }
  0x45   :  { %931 = vmatprep.subr.mxu0 %v139_v3  ;;  %474 = vmatpush1.msra.mxu1 %v399_v12  ;;  %v391_v17 = vld [vmem:[#allocation8 + $0x180] sm:$0xff]  ;;  %v388_v19 = vld [vmem:[#allocation8 + $0x168] sm:$0xff]  ;;  %v1257_v40 = vld [vmem:[#allocation8 + $0x1f8] sm:$0xff] }
  0x46   :  { %932 = vmatpush3.msra.mxu0 %v139_v3  ;;  %475 = vmatprep.subr.mxu1 %v396_v13  ;;  %v387_v20 = vld [vmem:[#allocation8 + $0x160] sm:$0xff]  ;;  %v132_v21 = vld [vmem:[#allocation7 + $0x28] sm:$0xff]  ;;  %v113_v41 = vld [vmem:[#allocation5 + $0x10] sm:$0xff] }
  0x47   :  { %933 = vmatprep.subr.mxu0 %v138_v5  ;;  %476 = vmatpush1.msra.mxu1 %v395_v14  ;;  %v384_v22 = vld [vmem:[#allocation8 + $0x148] sm:$0xff]  ;;  %v383_v23 = vld [vmem:[#allocation8 + $0x140] sm:$0xff]  ;;  %v1259_v42 = vld [vmem:[#allocation8 + $0x1f0] sm:$0xff] }
  0x48   :  { %934 = vmatpush3.msra.mxu0 %v138_v5  ;;  %477 = vmatprep.subr.mxu1 %v392_v16  ;;  %v131_v24 = vld [vmem:[#allocation7 + $0x20] sm:$0xff]  ;;  %v380_v25 = vld [vmem:[#allocation8 + $0x128] sm:$0xff]  ;;  %v1261_v43 = vld [vmem:[#allocation8 + $0x1d8] sm:$0xff] }
  0x49   :  { %935 = vmatprep.subr.mxu0 %v137_v6  ;;  %478 = vmatpush1.msra.mxu1 %v391_v17  ;;  %v379_v26 = vld [vmem:[#allocation8 + $0x120] sm:$0xff]  ;;  %v376_v28 = vld [vmem:[#allocation8 + $0x108] sm:$0xff]  ;;  %v1264_v45 = vld [vmem:[#allocation8 + $0x1d0] sm:$0xff] }
  0x4a   :  { %936 = vmatpush3.msra.mxu0 %v137_v6  ;;  %479 = vmatprep.subr.mxu1 %v388_v19  ;;  %v375_v29 = vld [vmem:[#allocation8 + $0x100] sm:$0xff]  ;;  %v372_v31 = vld [vmem:[#allocation8 + $0xe8] sm:$0xff]  ;;  %v114_v47 = vld [vmem:[#allocation5 + $0x18] sm:$0xff] }
  0x4b   :  { %937 = vmatprep.subr.mxu0 %v136_v7  ;;  %480 = vmatpush1.msra.mxu1 %v387_v20  ;;  %v371_v32 = vld [vmem:[#allocation8 + $0xe0] sm:$0xff]  ;;  %v128_v33 = vld [vmem:[#allocation7 + $0x8] sm:$0xff]  ;;  %v1267_v48 = vld [vmem:[#allocation8 + $0x1b8] sm:$0xff] }
  0x4c   :  { %938 = vmatpush3.msra.mxu0 %v136_v7  ;;  %481 = vmatprep.subr.mxu1 %v384_v22  ;;  %v368_v34 = vld [vmem:[#allocation8 + $0xc8] sm:$0xff]  ;;  %v367_v35 = vld [vmem:[#allocation8 + $0xc0] sm:$0xff]  ;;  %v1270_v50 = vld [vmem:[#allocation8 + $0x1b0] sm:$0xff] }
  0x4d   :  { %939 = vmatprep.subr.mxu0 %v135_v11  ;;  %482 = vmatpush1.msra.mxu1 %v383_v23  ;;  %v127_v36 = vld [vmem:[#allocation7] sm:$0xff]  ;;  %v364_v37 = vld [vmem:[#allocation8 + $0xa8] sm:$0xff]  ;;  %v1273_v51 = vld [vmem:[#allocation8 + $0x198] sm:$0xff] }
  0x4e   :  { %940 = vmatpush3.msra.mxu0 %v135_v11  ;;  %483 = vmatprep.subr.mxu1 %v380_v25  ;;  %v363_v38 = vld [vmem:[#allocation8 + $0xa0] sm:$0xff]  ;;  %v112_v39 = vld [vmem:[#allocation5 + $0x8] sm:$0xff]  ;;  %v1276_v53 = vld [vmem:[#allocation8 + $0x190] sm:$0xff] }
  0x4f   :  { %941 = vmatprep.subr.mxu0 %v134_v15  ;;  %484 = vmatpush1.msra.mxu1 %v379_v26  ;;  %v360_v44 = vld [vmem:[#allocation8 + $0x88] sm:$0xff]  ;;  %v359_v46 = vld [vmem:[#allocation8 + $0x80] sm:$0xff]  ;;  %v1279_v56 = vld [vmem:[#allocation8 + $0x178] sm:$0xff] }
  0x50   :  { %942 = vmatpush3.msra.mxu0 %v134_v15  ;;  %485 = vmatprep.subr.mxu1 %v376_v28  ;;  %v115_v49 = vld [vmem:[#allocation5 + $0x20] sm:$0xff]  ;;  %v356_v52 = vld [vmem:[#allocation8 + $0x68] sm:$0xff]  ;;  %v117_v57 = vld [vmem:[#allocation5 + $0x30] sm:$0xff] }
  0x51   :  { %943 = vmatprep.subr.mxu0 %v133_v18  ;;  %486 = vmatpush1.msra.mxu1 %v375_v29  ;;  %v355_v54 = vld [vmem:[#allocation8 + $0x60] sm:$0xff]  ;;  %v116_v55 = vld [vmem:[#allocation5 + $0x28] sm:$0xff]  ;;  %v1282_v58 = vld [vmem:[#allocation8 + $0x170] sm:$0xff] }
  0x52   :  { %944 = vmatpush3.msra.mxu0 %v133_v18  ;;  %487 = vmatprep.subr.mxu1 %v372_v31  ;;  %v1285_v59 = vld [vmem:[#allocation8 + $0x158] sm:$0xff]  ;;  %v1288_v60 = vld [vmem:[#allocation8 + $0x150] sm:$0xff]  ;;  %v119_v63 = vld [vmem:[#allocation5 + $0x40] sm:$0xff] }
  0x53   :  { %945 = vmatprep.subr.mxu0 %v132_v21  ;;  %488 = vmatpush1.msra.mxu1 %v371_v32  ;;  %v118_v61 = vld [vmem:[#allocation5 + $0x38] sm:$0xff]  ;;  %v1294_v0 = vld [vmem:[#allocation8 + $0x130] sm:$0xff]  ;;  %v120_v3 = vld [vmem:[#allocation5 + $0x48] sm:$0xff]  ;;  %v1184_v32 = vmov 0.0  }
  0x54   :  { %946 = vmatpush3.msra.mxu0 %v132_v21  ;;  %489 = vmatprep.subr.mxu1 %v368_v34  ;;  %v1291_v62 = vld [vmem:[#allocation8 + $0x138] sm:$0xff]  ;;  %v1300_v2 = vld [vmem:[#allocation8 + $0x110] sm:$0xff]  ;;  %v123_v11 = vld [vmem:[#allocation5 + $0x60] sm:$0xff] }
  0x55   :  { %947 = vmatprep.subr.mxu0 %v131_v24  ;;  %490 = vmatpush1.msra.mxu1 %v367_v35  ;;  %v1297_v1 = vld [vmem:[#allocation8 + $0x118] sm:$0xff]  ;;  %v121_v5 = vld [vmem:[#allocation5 + $0x50] sm:$0xff]  ;;  %v124_v15 = vld [vmem:[#allocation5 + $0x68] sm:$0xff] }
  0x56   :  { %948 = vmatpush3.msra.mxu0 %v131_v24  ;;  %491 = vmatprep.subr.mxu1 %v364_v37  ;;  %v1303_v4 = vld [vmem:[#allocation8 + $0xf8] sm:$0xff]  ;;  %v1306_v6 = vld [vmem:[#allocation8 + $0xf0] sm:$0xff]  ;;  %v352_v20 = vld [vmem:[#allocation8 + $0x48] sm:$0xff] }
  0x57   :  { %949 = vmatprep.subr.mxu0 %v130_v27  ;;  %492 = vmatpush1.msra.mxu1 %v363_v38  ;;  %v1309_v7 = vld [vmem:[#allocation8 + $0xd8] sm:$0xff]  ;;  %v1312_v8 = vld [vmem:[#allocation8 + $0xd0] sm:$0xff]  ;;  %v351_v22 = vld [vmem:[#allocation8 + $0x40] sm:$0xff] }
  0x58   :  { %950 = vmatpush3.msra.mxu0 %v130_v27  ;;  %493 = vmatprep.subr.mxu1 %v360_v44  ;;  %v122_v9 = vld [vmem:[#allocation5 + $0x58] sm:$0xff]  ;;  %v1318_v12 = vld [vmem:[#allocation8 + $0xb0] sm:$0xff]  ;;  %v348_v24 = vld [vmem:[#allocation8 + $0x28] sm:$0xff] }
  0x59   :  { %951 = vmatprep.subr.mxu0 %v129_v30  ;;  %494 = vmatpush1.msra.mxu1 %v359_v46  ;;  %v1315_v10 = vld [vmem:[#allocation8 + $0xb8] sm:$0xff]  ;;  %v1324_v14 = vld [vmem:[#allocation8 + $0x90] sm:$0xff]  ;;  %v347_v26 = vld [vmem:[#allocation8 + $0x20] sm:$0xff] }
  0x5a   :  { %952 = vmatpush3.msra.mxu0 %v129_v30  ;;  %495 = vmatprep.subr.mxu1 %v356_v52  ;;  %v1321_v13 = vld [vmem:[#allocation8 + $0x98] sm:$0xff]  ;;  %v125_v17 = vld [vmem:[#allocation5 + $0x70] sm:$0xff]  ;;  %v344_v28 = vld [vmem:[#allocation8 + $0x8] sm:$0xff] }
  0x5b   :  { %953 = vmatprep.subr.mxu0 %v128_v33  ;;  %496 = vmatpush1.msra.mxu1 %v355_v54  ;;  %v1327_v16 = vld [vmem:[#allocation8 + $0x78] sm:$0xff]  ;;  %v1332_v19 = vld [vmem:[#allocation8 + $0x70] sm:$0xff]  ;;  %v343_v30 = vld [vmem:[#allocation8] sm:$0xff] }
  0x5c   :  { %954 = vmatpush3.msra.mxu0 %v128_v33  ;;  %v126_v18 = vld [vmem:[#allocation5 + $0x78] sm:$0xff]  ;;  %497 = vmatprep.subr.mxu1 %v352_v20  ;;  %v1338_v23 = vld [vmem:[#allocation8 + $0x50] sm:$0xff]  ;;  %v96_v33 = vld [vmem:[#allocation2 + $0x8] sm:$0xff] }
  0x5d   :  { %955 = vmatprep.subr.mxu0 %v127_v36  ;;  %v1335_v21 = vld [vmem:[#allocation8 + $0x58] sm:$0xff]  ;;  %498 = vmatpush1.msra.mxu1 %v351_v22  ;;  %v1344_v27 = vld [vmem:[#allocation8 + $0x30] sm:$0xff]  ;;  %v1359_v35 = vld [vmem:[%s1473_s3] ss:$0 sm:$0xff]  ;;  %s1185_s3 = smov [#allocation11]  }
  0x5e   :  { %956 = vmatpush3.msra.mxu0 %v127_v36  ;;  %v1341_v25 = vld [vmem:[#allocation8 + $0x38] sm:$0xff]  ;;  %499 = vmatprep.subr.mxu1 %v348_v24  ;;  %v1350_v31 = vld [vmem:[#allocation8 + $0x10] sm:$0xff]  ;;  %v95_v36 = vld [vmem:[#allocation2] sm:$0xff]  ;;  %s862_s27 = sshll.u32 %s1185_s3, 4  ;;  %s863_s27 = int_to_ptr.vmem [resolvable:$true] %s862_s27 }
  0x5f   :  { %958 = vmatmul.mubr.f32.vlgmr.msra.gmra.mxu0 %v112_v39  ;;  %632 = vmatprep.subr.mxu0 %v1257_v40  ;;  %v1347_v29 = vld [vmem:[#allocation8 + $0x18] sm:$0xff]  ;;  %v100_v54 = vld [vmem:[#allocation2 + $0x28] sm:$0xff]  ;;  %s1125_s28 = scalar_lea.vmem %s863_s27, 2048  ;;  %p1130_p12 = scmp.lt.s32.totalorder %s863_s27, %s863_s27 }
  0x60   :  { %960 = vmatprep.mubr.f32.mxu0 %v113_v41  ;;  %633 = vmatpush1.msra.mxu0 %v1259_v42  ;;  %v98_v39 = vld [vmem:[#allocation2 + $0x18] sm:$0xff]  ;;  %v104_v22 = vld [vmem:[#allocation2 + $0x48] sm:$0xff]  ;;  %p1126_p11 = scmp.ne.s32.totalorder %s863_s27, %s1125_s28  ;;  %p1131_p13 = scmp.lt.s32.totalorder %s1125_s28, %s1125_s28 }
  0x61   :  { %634 = vmatprep.subr.mxu0 %v1261_v43  ;;  %500 = vmatpush1.msra.mxu1 %v347_v26 }
  0x62   :  { %635 = vmatpush1.msra.mxu0 %v1264_v45  ;;  %501 = vmatprep.subr.mxu1 %v344_v28  ;;  %p1132_p0 = por %p1131_p13, %p1130_p12 }
  0x63   :  { %961 = vmatmul.mubr.f32.gmra.mxu0 %v114_v47  ;;  %636 = vmatprep.subr.mxu0 %v1267_v48 }
  0x64   :  { %963 = vmatprep.mubr.f32.mxu0 %v115_v49  ;;  %637 = vmatpush1.msra.mxu0 %v1270_v50  ;;  %p1133_p1 = pnand %p1132_p0, %p1126_p11 }
  0x65   :  { %638 = vmatprep.subr.mxu0 %v1273_v51  ;;  %502 = vmatpush1.msra.mxu1 %v343_v30 }
  0x66   :  { %639 = vmatpush1.msra.mxu0 %v1276_v53  ;;  %535 = vmatprep.mubr.f32.mxu1 %v1184_v32 }
  0x67   :  { %964 = vmatmul.mubr.f32.gmra.mxu0 %v116_v55  ;;  %640 = vmatprep.subr.mxu0 %v1279_v56 }
  0x68   :  { %966 = vmatprep.mubr.f32.mxu0 %v117_v57  ;;  %641 = vmatpush1.msra.mxu0 %v1282_v58 }
  0x69   :  { %642 = vmatprep.subr.mxu0 %v1285_v59  ;;  %981 = vmatprep.subr.mxu1 %v1257_v40  ;;  %v97_v40 = vld [vmem:[#allocation2 + $0x10] sm:$0xff] }
  0x6a   :  { %643 = vmatpush1.msra.mxu0 %v1288_v60 }
  0x6b   :  { %967 = vmatmul.mubr.f32.gmra.mxu0 %v118_v61  ;;  %644 = vmatprep.subr.mxu0 %v1291_v62 }
  0x6c   :  { %969 = vmatprep.mubr.f32.mxu0 %v119_v63  ;;  %645 = vmatpush1.msra.mxu0 %v1294_v0  ;;  %v99_v63 = vld [vmem:[#allocation2 + $0x20] sm:$0xff] }
  0x6d   :  { %646 = vmatprep.subr.mxu0 %v1297_v1 }
  0x6e   :  { %647 = vmatpush1.msra.mxu0 %v1300_v2 }
  0x6f   :  { %970 = vmatmul.mubr.f32.gmra.mxu0 %v120_v3  ;;  %648 = vmatprep.subr.mxu0 %v1303_v4 }
  0x70   :  { %972 = vmatprep.mubr.f32.mxu0 %v121_v5  ;;  %649 = vmatpush1.msra.mxu0 %v1306_v6 }
  0x71   :  { %650 = vmatprep.subr.mxu0 %v1309_v7 }
  0x72   :  { %651 = vmatpush1.msra.mxu0 %v1312_v8 }
  0x73   :  { %973 = vmatmul.mubr.f32.gmra.mxu0 %v122_v9  ;;  %652 = vmatprep.subr.mxu0 %v1315_v10 }
  0x74   :  { %975 = vmatprep.mubr.f32.mxu0 %v123_v11  ;;  %653 = vmatpush1.msra.mxu0 %v1318_v12  ;;  %v102_v11 = vld [vmem:[#allocation2 + $0x38] sm:$0xff] }
  0x75   :  { %654 = vmatprep.subr.mxu0 %v1321_v13 }
  0x76   :  { %655 = vmatpush1.msra.mxu0 %v1324_v14 }
  0x77   :  { %976 = vmatmul.mubr.f32.gmra.mxu0 %v124_v15  ;;  %656 = vmatprep.subr.mxu0 %v1327_v16 }
  0x78   :  { %978 = vmatprep.mubr.f32.mxu0 %v125_v17  ;;  %657 = vmatpush1.msra.mxu0 %v1332_v19 }
  0x79   :  { %658 = vmatprep.subr.mxu0 %v1335_v21 }
  0x7a   :  { %659 = vmatpush1.msra.mxu0 %v1338_v23 }
  0x7b   :  { %979 = vmatmul.mubr.f32.gmra.mxu0 %v126_v18  ;;  %660 = vmatprep.subr.mxu0 %v1341_v25  ;;  %v101_v18 = vld [vmem:[#allocation2 + $0x30] sm:$0xff] }
  0x7c   :  { %661 = vmatpush1.msra.mxu0 %v1344_v27  ;;  %696 = vmatprep.mubr.f32.mxu0 %v1184_v32 }
  0x7d   :  { %662 = vmatprep.subr.mxu0 %v1347_v29 }
  0x7e   :  { %663 = vmatpush1.msra.mxu0 %v1350_v31 }
 0x11f   :  { %v959_v34 = vpop.f32.mrf.mxu0 }
 0x120   :  { %v289_v37 = vadd.f32 %v959_v34, %v96_v33  ;;  %v106_v33 = vld [vmem:[#allocation2 + $0x58] sm:$0xff] }
 0x121   :  { %v209_v38 = vpop.f32.mrf.mxu0 }
 0x122   :  { %v312_v41 = vadd.f32 %v1359_v35, %v289_v37  ;;  %v288_v44 = vadd.f32 %v209_v38, %v95_v36  ;;  %v105_v37 = vld [vmem:[#allocation2 + $0x50] sm:$0xff] }
 0x123   :  { %v962_v46 = vpop.f32.mrf.mxu0 }
 0x124   :  { %328 = vst [vmem:[#allocation11 + $0x8] sm:$0xff] %v312_v41  ;;  %v311_v47 = vadd.f32 %v1359_v35, %v288_v44  ;;  %v291_v49 = vadd.f32 %v962_v46, %v98_v39 }
 0x125   :  { %v219_v52 = vpop.f32.mrf.mxu0 }
 0x126   :  { %327 = vst [vmem:[#allocation11] sm:$0xff] %v311_v47  ;;  %v314_v55 = vadd.f32 %v1359_v35, %v291_v49  ;;  %536 = vmatmul.mubr.f32.vlgmr.msra.gmra.mxu1 %v311_v47  ;;  %697 = vmatmul.mubr.f32.vlgmr.msra.gmra.mxu0 %v311_v47  ;;  %v290_v57 = vadd.f32 %v219_v52, %v97_v40  ;;  %v107_v40 = vld [vmem:[#allocation2 + $0x60] sm:$0xff]  ;;  %v110_v52 = vld [vmem:[#allocation2 + $0x78] sm:$0xff] }
 0x127   :  { %997 = vmatpush1.msra.mxu1 %v1259_v42  ;;  %541 = vmatprep.mubr.f32.mxu1 %v1184_v32  ;;  %v965_v61 = vpop.f32.mrf.mxu0 }
 0x128   :  { %330 = vst [vmem:[#allocation11 + $0x18] sm:$0xff] %v314_v55  ;;  %v313_v3 = vadd.f32 %v1359_v35, %v290_v57  ;;  %982 = vmatprep.subr.mxu1 %v1261_v43  ;;  %702 = vmatprep.mubr.f32.mxu0 %v1184_v32  ;;  %v293_v5 = vadd.f32 %v965_v61, %v100_v54  ;;  %v109_v57 = vld [vmem:[#allocation2 + $0x70] sm:$0xff] }
 0x129   :  { %998 = vmatpush1.msra.mxu1 %v1264_v45  ;;  %v229_v9 = vpop.f32.mrf.mxu0 }
 0x12a   :  { %329 = vst [vmem:[#allocation11 + $0x10] sm:$0xff] %v313_v3  ;;  %542 = vmatmul.mubr.f32.gmra.mxu1 %v312_v41  ;;  %703 = vmatmul.mubr.f32.gmra.mxu0 %v312_v41  ;;  %v316_v42 = vadd.f32 %v1359_v35, %v293_v5  ;;  %v292_v15 = vadd.f32 %v229_v9, %v99_v63  ;;  %v108_v41 = vld [vmem:[#allocation2 + $0x68] sm:$0xff] }
 0x12b   :  { %547 = vmatprep.mubr.f32.mxu1 %v1184_v32  ;;  %983 = vmatprep.subr.mxu1 %v1267_v48  ;;  %v968_v17 = vpop.f32.mrf.mxu0 }
 0x12c   :  { %332 = vst [vmem:[#allocation11 + $0x28] sm:$0xff] %v316_v42  ;;  %708 = vmatprep.mubr.f32.mxu0 %v1184_v32  ;;  %999 = vmatpush1.msra.mxu1 %v1270_v50  ;;  %v315_v43 = vadd.f32 %v1359_v35, %v292_v15  ;;  %v295_v45 = vadd.f32 %v968_v17, %v102_v11  ;;  %v103_v50 = vld [vmem:[#allocation2 + $0x40] sm:$0xff] }
 0x12d   :  { %984 = vmatprep.subr.mxu1 %v1273_v51  ;;  %v239_v20 = vpop.f32.mrf.mxu0 }
 0x12e   :  { %548 = vmatmul.mubr.f32.gmra.mxu1 %v313_v3  ;;  %709 = vmatmul.mubr.f32.gmra.mxu0 %v313_v3  ;;  %331 = vst [vmem:[#allocation11 + $0x20] sm:$0xff] %v315_v43  ;;  %v1378_v24 = vadd.f32 %v1359_v35, %v295_v45  ;;  %v294_v48 = vadd.f32 %v239_v20, %v101_v18 }
 0x12f   :  { %553 = vmatprep.mubr.f32.mxu1 %v1184_v32  ;;  %714 = vmatprep.mubr.f32.mxu0 %v1184_v32  ;;  %v971_v26 = vpop.f32.mrf.mxu0 }
 0x130   :  { %1000 = vmatpush1.msra.mxu1 %v1276_v53  ;;  %334 = vst [vmem:[#allocation11 + $0x38] sm:$0xff] %v1378_v24  ;;  %v317_v51 = vadd.f32 %v1359_v35, %v294_v48  ;;  %v297_v28 = vadd.f32 %v971_v26, %v104_v22 }
 0x131   :  { %985 = vmatprep.subr.mxu1 %v1279_v56  ;;  %v249_v30 = vpop.f32.mrf.mxu0 }
 0x132   :  { %554 = vmatmul.mubr.f32.gmra.mxu1 %v314_v55  ;;  %715 = vmatmul.mubr.f32.gmra.mxu0 %v314_v55  ;;  %333 = vst [vmem:[#allocation11 + $0x30] sm:$0xff] %v317_v51  ;;  %v1387_v34 = vadd.f32 %v1359_v35, %v297_v28  ;;  %v296_v36 = vadd.f32 %v249_v30, %v103_v50 }
 0x133   :  { %559 = vmatprep.mubr.f32.mxu1 %v1184_v32  ;;  %720 = vmatprep.mubr.f32.mxu0 %v1184_v32  ;;  %v974_v53 = vpop.f32.mrf.mxu0 }
 0x134   :  { %1001 = vmatpush1.msra.mxu1 %v1282_v58  ;;  %336 = vst [vmem:[#allocation11 + $0x48] sm:$0xff] %v1387_v34  ;;  %v319_v56 = vadd.f32 %v1359_v35, %v296_v36  ;;  %v299_v38 = vadd.f32 %v974_v53, %v106_v33 }
 0x135   :  { %986 = vmatprep.subr.mxu1 %v1285_v59  ;;  %v259_v39 = vpop.f32.mrf.mxu0 }
 0x136   :  { %560 = vmatmul.mubr.f32.gmra.mxu1 %v315_v43  ;;  %721 = vmatmul.mubr.f32.gmra.mxu0 %v315_v43  ;;  %335 = vst [vmem:[#allocation11 + $0x40] sm:$0xff] %v319_v56  ;;  %v1396_v44 = vadd.f32 %v1359_v35, %v299_v38  ;;  %v298_v46 = vadd.f32 %v259_v39, %v105_v37 }
 0x137   :  { %565 = vmatprep.mubr.f32.mxu1 %v1184_v32  ;;  %726 = vmatprep.mubr.f32.mxu0 %v1184_v32  ;;  %v977_v58 = vpop.f32.mrf.mxu0 }
 0x138   :  { %1002 = vmatpush1.msra.mxu1 %v1288_v60  ;;  %338 = vst [vmem:[#allocation11 + $0x58] sm:$0xff] %v1396_v44  ;;  %v321_v59 = vadd.f32 %v1359_v35, %v298_v46  ;;  %v301_v47 = vadd.f32 %v977_v58, %v108_v41 }
 0x139   :  { %987 = vmatprep.subr.mxu1 %v1291_v62  ;;  %v269_v49 = vpop.f32.mrf.mxu0 }
 0x13a   :  { %566 = vmatmul.mubr.f32.gmra.mxu1 %v316_v42  ;;  %727 = vmatmul.mubr.f32.gmra.mxu0 %v316_v42  ;;  %337 = vst [vmem:[#allocation11 + $0x50] sm:$0xff] %v321_v59  ;;  %v1405_v54 = vadd.f32 %v1359_v35, %v301_v47  ;;  %v300_v55 = vadd.f32 %v269_v49, %v107_v40 }
 0x13b   :  { %571 = vmatprep.mubr.f32.mxu1 %v1184_v32  ;;  %732 = vmatprep.mubr.f32.mxu0 %v1184_v32  ;;  %v980_v60 = vpop.f32.mrf.mxu0 }
 0x13c   :  { %1003 = vmatpush1.msra.mxu1 %v1294_v0  ;;  %340 = vst [vmem:[#allocation11 + $0x68] sm:$0xff] %v1405_v54  ;;  %v323_v62 = vadd.f32 %v1359_v35, %v300_v55  ;;  %v303_v61 = vadd.f32 %v980_v60, %v110_v52 }
 0x13d   :  { %988 = vmatprep.subr.mxu1 %v1297_v1  ;;  %v279_v63 = vpop.f32.mrf.mxu0 }
 0x13e   :  { %572 = vmatmul.mubr.f32.gmra.mxu1 %v317_v51  ;;  %733 = vmatmul.mubr.f32.gmra.mxu0 %v317_v51  ;;  %339 = vst [vmem:[#allocation11 + $0x60] sm:$0xff] %v323_v62  ;;  %v326_v3 = vadd.f32 %v1359_v35, %v303_v61  ;;  %v302_v5 = vadd.f32 %v279_v63, %v109_v57 }
 0x13f   :  { %577 = vmatprep.mubr.f32.mxu1 %v1184_v32  ;;  %738 = vmatprep.mubr.f32.mxu0 %v1184_v32 }
 0x140   :  { %1004 = vmatpush1.msra.mxu1 %v1300_v2  ;;  %342 = vst [vmem:[#allocation11 + $0x78] sm:$0xff] %v326_v3  ;;  %v325_v0 = vadd.f32 %v1359_v35, %v302_v5 }
 0x141   :  { %989 = vmatprep.subr.mxu1 %v1303_v4 }
 0x142   :  { %578 = vmatmul.mubr.f32.gmra.mxu1 %v1378_v24  ;;  %739 = vmatmul.mubr.f32.gmra.mxu0 %v1378_v24  ;;  %341 = vst [vmem:[#allocation11 + $0x70] sm:$0xff] %v325_v0 }
 0x143   :  { %583 = vmatprep.mubr.f32.mxu1 %v1184_v32  ;;  %744 = vmatprep.mubr.f32.mxu0 %v1184_v32 }
 0x144   :  { %1005 = vmatpush1.msra.mxu1 %v1306_v6 }
 0x145   :  { %990 = vmatprep.subr.mxu1 %v1309_v7 }
 0x146   :  { %584 = vmatmul.mubr.f32.gmra.mxu1 %v319_v56  ;;  %745 = vmatmul.mubr.f32.gmra.mxu0 %v319_v56 }
 0x147   :  { %589 = vmatprep.mubr.f32.mxu1 %v1184_v32  ;;  %750 = vmatprep.mubr.f32.mxu0 %v1184_v32 }
 0x148   :  { %1006 = vmatpush1.msra.mxu1 %v1312_v8 }
 0x149   :  { %991 = vmatprep.subr.mxu1 %v1315_v10 }
 0x14a   :  { %590 = vmatmul.mubr.f32.gmra.mxu1 %v1387_v34  ;;  %751 = vmatmul.mubr.f32.gmra.mxu0 %v1387_v34 }
 0x14b   :  { %595 = vmatprep.mubr.f32.mxu1 %v1184_v32  ;;  %756 = vmatprep.mubr.f32.mxu0 %v1184_v32 }
 0x14c   :  { %1007 = vmatpush1.msra.mxu1 %v1318_v12 }
 0x14d   :  { %992 = vmatprep.subr.mxu1 %v1321_v13 }
 0x14e   :  { %596 = vmatmul.mubr.f32.gmra.mxu1 %v321_v59  ;;  %757 = vmatmul.mubr.f32.gmra.mxu0 %v321_v59 }
 0x14f   :  { %601 = vmatprep.mubr.f32.mxu1 %v1184_v32  ;;  %762 = vmatprep.mubr.f32.mxu0 %v1184_v32 }
 0x150   :  { %1008 = vmatpush1.msra.mxu1 %v1324_v14 }
 0x151   :  { %993 = vmatprep.subr.mxu1 %v1327_v16 }
 0x152   :  { %602 = vmatmul.mubr.f32.gmra.mxu1 %v1396_v44  ;;  %763 = vmatmul.mubr.f32.gmra.mxu0 %v1396_v44 }
 0x153   :  { %607 = vmatprep.mubr.f32.mxu1 %v1184_v32  ;;  %1009 = vmatpush1.msra.mxu1 %v1332_v19 }
 0x154   :  { %994 = vmatprep.subr.mxu1 %v1335_v21 }
 0x155   :  { %1010 = vmatpush1.msra.mxu1 %v1338_v23 }
 0x156   :  { %608 = vmatmul.mubr.f32.gmra.mxu1 %v323_v62  ;;  %995 = vmatprep.subr.mxu1 %v1341_v25 }
 0x157   :  { %613 = vmatprep.mubr.f32.mxu1 %v1184_v32  ;;  %1011 = vmatpush1.msra.mxu1 %v1344_v27 }
 0x158   :  { %996 = vmatprep.subr.mxu1 %v1347_v29 }
 0x159   :  { %1012 = vmatpush1.msra.mxu1 %v1350_v31 }
 0x15a   :  { %614 = vmatmul.mubr.f32.gmra.mxu1 %v1405_v54 }
 0x15b   :  { %619 = vmatprep.mubr.f32.mxu1 %v1184_v32 }
 0x15e   :  { %620 = vmatmul.mubr.f32.gmra.mxu1 %v325_v0 }
 0x15f   :  { %625 = vmatprep.mubr.f32.mxu1 %v1184_v32 }
 0x162   :  { %626 = vmatmul.mubr.f32.gmra.mxu1 %v326_v3 }
 0x163   :  { %768 = vmatprep.mubr.f32.mxu1 %v1184_v32 }
 0x166   :  { %769 = vmatmul.mubr.f32.vlgmr.msra.gmra.mxu1 %v323_v62 }
 0x167   :  { %774 = vmatprep.mubr.f32.mxu1 %v1184_v32 }
 0x16a   :  { %775 = vmatmul.mubr.f32.gmra.mxu1 %v1405_v54 }
 0x16b   :  { %780 = vmatprep.mubr.f32.mxu1 %v1184_v32 }
 0x16e   :  { %781 = vmatmul.mubr.f32.gmra.mxu1 %v325_v0 }
 0x16f   :  { %786 = vmatprep.mubr.f32.mxu1 %v1184_v32 }
 0x172   :  { %787 = vmatmul.mubr.f32.gmra.mxu1 %v326_v3 }
 0x173   :  { %1136 = shalt.err (!%p1133_p1)
}
 0x174   :  { %868 = dma.vmem_to_hbm [thread:$0]  %s863_s27, 2048, %s1476_s6, [#allocation4], %s1177_s29, %s1177_s29, %s1178_s30   ;;  %v407_v1 = vld [vmem:[#allocation10] sm:$0xff]  ;;  %v409_v2 = vld [vmem:[#allocation10 + $0x10] sm:$0xff]  ;;  %v408_v7 = vld [vmem:[#allocation10 + $0x8] sm:$0xff] }
 0x175   :  { %v410_v8 = vld [vmem:[#allocation10 + $0x18] sm:$0xff]  ;;  %v411_v16 = vld [vmem:[#allocation10 + $0x20] sm:$0xff]  ;;  %v413_v19 = vld [vmem:[#allocation10 + $0x30] sm:$0xff]  ;;  %s1186_s6 = smov [#allocation12]  }
 0x176   :  { %v412_v29 = vld [vmem:[#allocation10 + $0x28] sm:$0xff]  ;;  %v414_v31 = vld [vmem:[#allocation10 + $0x38] sm:$0xff]  ;;  %v415_v42 = vld [vmem:[#allocation10 + $0x40] sm:$0xff]  ;;  %s874_s29 = sshll.u32 %s1186_s6, 4  ;;  %s875_s29 = int_to_ptr.vmem [resolvable:$true] %s874_s29 }
 0x177   :  { %v417_v15 = vld [vmem:[#allocation10 + $0x50] sm:$0xff]  ;;  %v416_v20 = vld [vmem:[#allocation10 + $0x48] sm:$0xff]  ;;  %v418_v22 = vld [vmem:[#allocation10 + $0x58] sm:$0xff]  ;;  %s1145_s30 = scalar_lea.vmem %s875_s29, 8192  ;;  %p1150_p3 = scmp.lt.s32.totalorder %s875_s29, %s875_s29 }
 0x178   :  { %v419_v51 = vld [vmem:[#allocation10 + $0x60] sm:$0xff]  ;;  %v421_v28 = vld [vmem:[#allocation10 + $0x70] sm:$0xff]  ;;  %v420_v53 = vld [vmem:[#allocation10 + $0x68] sm:$0xff]  ;;  %p1146_p2 = scmp.ne.s32.totalorder %s875_s29, %s1145_s30  ;;  %p1151_p4 = scmp.lt.s32.totalorder %s1145_s30, %s1145_s30 }
 0x179   :  { %v422_v37 = vld [vmem:[#allocation10 + $0x78] sm:$0xff]  ;;  %v423_v44 = vld [vmem:[#allocation10 + $0x80] sm:$0xff]  ;;  %v425_v46 = vld [vmem:[#allocation10 + $0x90] sm:$0xff] }
 0x17a   :  { %v424_v49 = vld [vmem:[#allocation10 + $0x88] sm:$0xff]  ;;  %v426_v52 = vld [vmem:[#allocation10 + $0x98] sm:$0xff]  ;;  %v427_v62 = vld [vmem:[#allocation10 + $0xa0] sm:$0xff]  ;;  %p1152_p5 = por %p1151_p4, %p1150_p3 }
 0x17b   :  { %v429_v61 = vld [vmem:[#allocation10 + $0xb0] sm:$0xff] }
 0x17c   :  { %p1153_p6 = pnand %p1152_p5, %p1146_p2 }
 0x1e6   :  { %v537_v4 = vpop.f32.mrf.mxu1  ;;  %v698_v6 = vpop.f32.mrf.mxu0 }
 0x1e7   :  { %v538_v10 = vadd.f32 %v537_v4, %v407_v1  ;;  %v699_v12 = vadd.f32 %v698_v6, %v409_v2  ;;  %v428_v1 = vld [vmem:[#allocation10 + $0xa8] sm:$0xff]  ;;  %v430_v2 = vld [vmem:[#allocation10 + $0xb8] sm:$0xff] }
 0x1e8   :  { %v539_v13 = vpop.f32.mrf.mxu1  ;;  %v700_v14 = vpop.f32.mrf.mxu0 }
 0x1e9   :  { %793 = vst [vmem:[#allocation12] sm:$0xff] %v538_v10  ;;  %795 = vst [vmem:[#allocation12 + $0x10] sm:$0xff] %v699_v12  ;;  %v540_v21 = vadd.f32 %v539_v13, %v408_v7  ;;  %v701_v23 = vadd.f32 %v700_v14, %v410_v8  ;;  %v431_v10 = vld [vmem:[#allocation10 + $0xc0] sm:$0xff]  ;;  %v433_v12 = vld [vmem:[#allocation10 + $0xd0] sm:$0xff] }
 0x1ea   :  { %v543_v25 = vpop.f32.mrf.mxu1  ;;  %v704_v27 = vpop.f32.mrf.mxu0 }
 0x1eb   :  { %794 = vst [vmem:[#allocation12 + $0x8] sm:$0xff] %v540_v21  ;;  %796 = vst [vmem:[#allocation12 + $0x18] sm:$0xff] %v701_v23  ;;  %v544_v32 = vadd.f32 %v543_v25, %v411_v16  ;;  %v705_v35 = vadd.f32 %v704_v27, %v413_v19  ;;  %v432_v21 = vld [vmem:[#allocation10 + $0xc8] sm:$0xff]  ;;  %v434_v23 = vld [vmem:[#allocation10 + $0xd8] sm:$0xff] }
 0x1ec   :  { %v545_v9 = vpop.f32.mrf.mxu1  ;;  %v706_v11 = vpop.f32.mrf.mxu0 }
 0x1ed   :  { %797 = vst [vmem:[#allocation12 + $0x20] sm:$0xff] %v544_v32  ;;  %799 = vst [vmem:[#allocation12 + $0x30] sm:$0xff] %v705_v35  ;;  %v546_v17 = vadd.f32 %v545_v9, %v412_v29  ;;  %v707_v18 = vadd.f32 %v706_v11, %v414_v31  ;;  %v435_v32 = vld [vmem:[#allocation10 + $0xe0] sm:$0xff]  ;;  %v437_v35 = vld [vmem:[#allocation10 + $0xf0] sm:$0xff] }
 0x1ee   :  { %v549_v43 = vpop.f32.mrf.mxu1  ;;  %v710_v45 = vpop.f32.mrf.mxu0 }
 0x1ef   :  { %798 = vst [vmem:[#allocation12 + $0x28] sm:$0xff] %v546_v17  ;;  %800 = vst [vmem:[#allocation12 + $0x38] sm:$0xff] %v707_v18  ;;  %v550_v24 = vadd.f32 %v549_v43, %v415_v42  ;;  %v711_v48 = vadd.f32 %v710_v45, %v417_v15  ;;  %v436_v17 = vld [vmem:[#allocation10 + $0xe8] sm:$0xff]  ;;  %v438_v18 = vld [vmem:[#allocation10 + $0xf8] sm:$0xff] }
 0x1f0   :  { %v551_v26 = vpop.f32.mrf.mxu1  ;;  %v712_v50 = vpop.f32.mrf.mxu0 }
 0x1f1   :  { %801 = vst [vmem:[#allocation12 + $0x40] sm:$0xff] %v550_v24  ;;  %803 = vst [vmem:[#allocation12 + $0x50] sm:$0xff] %v711_v48  ;;  %v552_v30 = vadd.f32 %v551_v26, %v416_v20  ;;  %v713_v33 = vadd.f32 %v712_v50, %v418_v22  ;;  %v439_v24 = vld [vmem:[#allocation10 + $0x100] sm:$0xff]  ;;  %v441_v48 = vld [vmem:[#allocation10 + $0x110] sm:$0xff] }
 0x1f2   :  { %v555_v34 = vpop.f32.mrf.mxu1  ;;  %v716_v36 = vpop.f32.mrf.mxu0 }
 0x1f3   :  { %802 = vst [vmem:[#allocation12 + $0x48] sm:$0xff] %v552_v30  ;;  %804 = vst [vmem:[#allocation12 + $0x58] sm:$0xff] %v713_v33  ;;  %v556_v56 = vadd.f32 %v555_v34, %v419_v51  ;;  %v717_v38 = vadd.f32 %v716_v36, %v421_v28  ;;  %v440_v30 = vld [vmem:[#allocation10 + $0x108] sm:$0xff]  ;;  %v442_v33 = vld [vmem:[#allocation10 + $0x118] sm:$0xff] }
 0x1f4   :  { %v557_v39 = vpop.f32.mrf.mxu1  ;;  %v718_v41 = vpop.f32.mrf.mxu0 }
 0x1f5   :  { %805 = vst [vmem:[#allocation12 + $0x60] sm:$0xff] %v556_v56  ;;  %807 = vst [vmem:[#allocation12 + $0x70] sm:$0xff] %v717_v38  ;;  %v558_v58 = vadd.f32 %v557_v39, %v420_v53  ;;  %v719_v40 = vadd.f32 %v718_v41, %v422_v37  ;;  %v443_v56 = vld [vmem:[#allocation10 + $0x120] sm:$0xff]  ;;  %v445_v38 = vld [vmem:[#allocation10 + $0x130] sm:$0xff] }
 0x1f6   :  { %v561_v59 = vpop.f32.mrf.mxu1  ;;  %v722_v47 = vpop.f32.mrf.mxu0 }
 0x1f7   :  { %806 = vst [vmem:[#allocation12 + $0x68] sm:$0xff] %v558_v58  ;;  %808 = vst [vmem:[#allocation12 + $0x78] sm:$0xff] %v719_v40  ;;  %v562_v54 = vadd.f32 %v561_v59, %v423_v44  ;;  %v723_v55 = vadd.f32 %v722_v47, %v425_v46  ;;  %v444_v58 = vld [vmem:[#allocation10 + $0x128] sm:$0xff]  ;;  %v446_v40 = vld [vmem:[#allocation10 + $0x138] sm:$0xff] }
 0x1f8   :  { %v563_v60 = vpop.f32.mrf.mxu1  ;;  %v724_v57 = vpop.f32.mrf.mxu0 }
 0x1f9   :  { %809 = vst [vmem:[#allocation12 + $0x80] sm:$0xff] %v562_v54  ;;  %811 = vst [vmem:[#allocation12 + $0x90] sm:$0xff] %v723_v55  ;;  %v564_v63 = vadd.f32 %v563_v60, %v424_v49  ;;  %v725_v3 = vadd.f32 %v724_v57, %v426_v52  ;;  %v447_v54 = vld [vmem:[#allocation10 + $0x140] sm:$0xff]  ;;  %v449_v55 = vld [vmem:[#allocation10 + $0x150] sm:$0xff] }
 0x1fa   :  { %v567_v5 = vpop.f32.mrf.mxu1  ;;  %v728_v0 = vpop.f32.mrf.mxu0 }
 0x1fb   :  { %810 = vst [vmem:[#allocation12 + $0x88] sm:$0xff] %v564_v63  ;;  %812 = vst [vmem:[#allocation12 + $0x98] sm:$0xff] %v725_v3  ;;  %v568_v4 = vadd.f32 %v567_v5, %v427_v62  ;;  %v729_v6 = vadd.f32 %v728_v0, %v429_v61  ;;  %v448_v63 = vld [vmem:[#allocation10 + $0x148] sm:$0xff]  ;;  %v450_v3 = vld [vmem:[#allocation10 + $0x158] sm:$0xff] }
 0x1fc   :  { %v569_v7 = vpop.f32.mrf.mxu1  ;;  %v730_v8 = vpop.f32.mrf.mxu0 }
 0x1fd   :  { %813 = vst [vmem:[#allocation12 + $0xa0] sm:$0xff] %v568_v4  ;;  %815 = vst [vmem:[#allocation12 + $0xb0] sm:$0xff] %v729_v6  ;;  %v570_v13 = vadd.f32 %v569_v7, %v428_v1  ;;  %v731_v14 = vadd.f32 %v730_v8, %v430_v2  ;;  %v451_v4 = vld [vmem:[#allocation10 + $0x160] sm:$0xff]  ;;  %v453_v6 = vld [vmem:[#allocation10 + $0x170] sm:$0xff] }
 0x1fe   :  { %v573_v16 = vpop.f32.mrf.mxu1  ;;  %v734_v19 = vpop.f32.mrf.mxu0 }
 0x1ff   :  { %814 = vst [vmem:[#allocation12 + $0xa8] sm:$0xff] %v570_v13  ;;  %816 = vst [vmem:[#allocation12 + $0xb8] sm:$0xff] %v731_v14  ;;  %v574_v25 = vadd.f32 %v573_v16, %v431_v10  ;;  %v735_v27 = vadd.f32 %v734_v19, %v433_v12  ;;  %v452_v13 = vld [vmem:[#allocation10 + $0x168] sm:$0xff]  ;;  %v454_v14 = vld [vmem:[#allocation10 + $0x178] sm:$0xff] }
 0x200   :  { %v575_v29 = vpop.f32.mrf.mxu1  ;;  %v736_v31 = vpop.f32.mrf.mxu0 }
 0x201   :  { %817 = vst [vmem:[#allocation12 + $0xc0] sm:$0xff] %v574_v25  ;;  %819 = vst [vmem:[#allocation12 + $0xd0] sm:$0xff] %v735_v27  ;;  %v576_v9 = vadd.f32 %v575_v29, %v432_v21  ;;  %v737_v11 = vadd.f32 %v736_v31, %v434_v23  ;;  %v455_v25 = vld [vmem:[#allocation10 + $0x180] sm:$0xff] }
 0x202   :  { %v579_v42 = vpop.f32.mrf.mxu1  ;;  %v740_v15 = vpop.f32.mrf.mxu0 }
 0x203   :  { %818 = vst [vmem:[#allocation12 + $0xc8] sm:$0xff] %v576_v9  ;;  %820 = vst [vmem:[#allocation12 + $0xd8] sm:$0xff] %v737_v11  ;;  %v580_v43 = vadd.f32 %v579_v42, %v435_v32  ;;  %v741_v45 = vadd.f32 %v740_v15, %v437_v35  ;;  %v456_v32 = vld [vmem:[#allocation10 + $0x188] sm:$0xff]  ;;  %v459_v11 = vld [vmem:[#allocation10 + $0x1a0] sm:$0xff] }
 0x204   :  { %v581_v20 = vpop.f32.mrf.mxu1  ;;  %v742_v22 = vpop.f32.mrf.mxu0 }
 0x205   :  { %821 = vst [vmem:[#allocation12 + $0xe0] sm:$0xff] %v580_v43  ;;  %823 = vst [vmem:[#allocation12 + $0xf0] sm:$0xff] %v741_v45  ;;  %v582_v26 = vadd.f32 %v581_v20, %v436_v17  ;;  %v743_v50 = vadd.f32 %v742_v22, %v438_v18  ;;  %v460_v17 = vld [vmem:[#allocation10 + $0x1a8] sm:$0xff]  ;;  %v463_v45 = vld [vmem:[#allocation10 + $0x1c0] sm:$0xff] }
 0x206   :  { %v585_v51 = vpop.f32.mrf.mxu1  ;;  %v746_v28 = vpop.f32.mrf.mxu0 }
 0x207   :  { %822 = vst [vmem:[#allocation12 + $0xe8] sm:$0xff] %v582_v26  ;;  %824 = vst [vmem:[#allocation12 + $0xf8] sm:$0xff] %v743_v50  ;;  %v586_v34 = vadd.f32 %v585_v51, %v439_v24  ;;  %v747_v36 = vadd.f32 %v746_v28, %v441_v48  ;;  %v464_v24 = vld [vmem:[#allocation10 + $0x1c8] sm:$0xff]  ;;  %v467_v50 = vld [vmem:[#allocation10 + $0x1e0] sm:$0xff] }
 0x208   :  { %v587_v53 = vpop.f32.mrf.mxu1  ;;  %v748_v37 = vpop.f32.mrf.mxu0 }
 0x209   :  { %825 = vst [vmem:[#allocation12 + $0x100] sm:$0xff] %v586_v34  ;;  %827 = vst [vmem:[#allocation12 + $0x110] sm:$0xff] %v747_v36  ;;  %v588_v39 = vadd.f32 %v587_v53, %v440_v30  ;;  %v749_v41 = vadd.f32 %v748_v37, %v442_v33  ;;  %v468_v30 = vld [vmem:[#allocation10 + $0x1e8] sm:$0xff]  ;;  %v457_v36 = vld [vmem:[#allocation10 + $0x190] sm:$0xff] }
 0x20a   :  { %v591_v44 = vpop.f32.mrf.mxu1  ;;  %v752_v46 = vpop.f32.mrf.mxu0 }
 0x20b   :  { %826 = vst [vmem:[#allocation12 + $0x108] sm:$0xff] %v588_v39  ;;  %828 = vst [vmem:[#allocation12 + $0x118] sm:$0xff] %v749_v41  ;;  %v592_v59 = vadd.f32 %v591_v44, %v443_v56  ;;  %v753_v47 = vadd.f32 %v752_v46, %v445_v38  ;;  %v458_v56 = vld [vmem:[#allocation10 + $0x198] sm:$0xff]  ;;  %v461_v41 = vld [vmem:[#allocation10 + $0x1b0] sm:$0xff] }
 0x20c   :  { %v593_v49 = vpop.f32.mrf.mxu1  ;;  %v754_v52 = vpop.f32.mrf.mxu0 }
 0x20d   :  { %829 = vst [vmem:[#allocation12 + $0x120] sm:$0xff] %v592_v59  ;;  %831 = vst [vmem:[#allocation12 + $0x130] sm:$0xff] %v753_v47  ;;  %v594_v60 = vadd.f32 %v593_v49, %v444_v58  ;;  %v755_v57 = vadd.f32 %v754_v52, %v446_v40  ;;  %v462_v58 = vld [vmem:[#allocation10 + $0x1b8] sm:$0xff]  ;;  %v465_v47 = vld [vmem:[#allocation10 + $0x1d0] sm:$0xff] }
 0x20e   :  { %v597_v62 = vpop.f32.mrf.mxu1  ;;  %v758_v61 = vpop.f32.mrf.mxu0 }
 0x20f   :  { %830 = vst [vmem:[#allocation12 + $0x128] sm:$0xff] %v594_v60  ;;  %832 = vst [vmem:[#allocation12 + $0x138] sm:$0xff] %v755_v57  ;;  %v598_v5 = vadd.f32 %v597_v62, %v447_v54  ;;  %v759_v0 = vadd.f32 %v758_v61, %v449_v55  ;;  %v466_v54 = vld [vmem:[#allocation10 + $0x1d8] sm:$0xff]  ;;  %v469_v57 = vld [vmem:[#allocation10 + $0x1f0] sm:$0xff] }
 0x210   :  { %v599_v1 = vpop.f32.mrf.mxu1  ;;  %v760_v2 = vpop.f32.mrf.mxu0 }
 0x211   :  { %833 = vst [vmem:[#allocation12 + $0x140] sm:$0xff] %v598_v5  ;;  %835 = vst [vmem:[#allocation12 + $0x150] sm:$0xff] %v759_v0  ;;  %v600_v7 = vadd.f32 %v599_v1, %v448_v63  ;;  %v761_v8 = vadd.f32 %v760_v2, %v450_v3  ;;  %v470_v63 = vld [vmem:[#allocation10 + $0x1f8] sm:$0xff] }
 0x212   :  { %v603_v10 = vpop.f32.mrf.mxu1  ;;  %v764_v12 = vpop.f32.mrf.mxu0 }
 0x213   :  { %834 = vst [vmem:[#allocation12 + $0x148] sm:$0xff] %v600_v7  ;;  %836 = vst [vmem:[#allocation12 + $0x158] sm:$0xff] %v761_v8  ;;  %v604_v16 = vadd.f32 %v603_v10, %v451_v4  ;;  %v765_v19 = vadd.f32 %v764_v12, %v453_v6 }
 0x214   :  { %v605_v21 = vpop.f32.mrf.mxu1  ;;  %v766_v23 = vpop.f32.mrf.mxu0 }
 0x215   :  { %837 = vst [vmem:[#allocation12 + $0x160] sm:$0xff] %v604_v16  ;;  %839 = vst [vmem:[#allocation12 + $0x170] sm:$0xff] %v765_v19  ;;  %v606_v27 = vadd.f32 %v605_v21, %v452_v13  ;;  %v767_v29 = vadd.f32 %v766_v23, %v454_v14 }
 0x216   :  { %v609_v31 = vpop.f32.mrf.mxu1 }
 0x217   :  { %838 = vst [vmem:[#allocation12 + $0x168] sm:$0xff] %v606_v27  ;;  %840 = vst [vmem:[#allocation12 + $0x178] sm:$0xff] %v767_v29  ;;  %v610_v35 = vadd.f32 %v609_v31, %v455_v25 }
 0x218   :  { %v611_v9 = vpop.f32.mrf.mxu1 }
 0x219   :  { %841 = vst [vmem:[#allocation12 + $0x180] sm:$0xff] %v610_v35  ;;  %v612_v42 = vadd.f32 %v611_v9, %v456_v32 }
 0x21a   :  { %v615_v15 = vpop.f32.mrf.mxu1 }
 0x21b   :  { %842 = vst [vmem:[#allocation12 + $0x188] sm:$0xff] %v612_v42  ;;  %v616_v18 = vadd.f32 %v615_v15, %v459_v11 }
 0x21c   :  { %v617_v43 = vpop.f32.mrf.mxu1 }
 0x21d   :  { %845 = vst [vmem:[#allocation12 + $0x1a0] sm:$0xff] %v616_v18  ;;  %v618_v20 = vadd.f32 %v617_v43, %v460_v17 }
 0x21e   :  { %v621_v22 = vpop.f32.mrf.mxu1 }
 0x21f   :  { %846 = vst [vmem:[#allocation12 + $0x1a8] sm:$0xff] %v618_v20  ;;  %v622_v48 = vadd.f32 %v621_v22, %v463_v45 }
 0x220   :  { %v623_v26 = vpop.f32.mrf.mxu1 }
 0x221   :  { %849 = vst [vmem:[#allocation12 + $0x1c0] sm:$0xff] %v622_v48  ;;  %v624_v51 = vadd.f32 %v623_v26, %v464_v24 }
 0x222   :  { %v627_v28 = vpop.f32.mrf.mxu1 }
 0x223   :  { %850 = vst [vmem:[#allocation12 + $0x1c8] sm:$0xff] %v624_v51  ;;  %v628_v33 = vadd.f32 %v627_v28, %v467_v50 }
 0x224   :  { %v629_v34 = vpop.f32.mrf.mxu1 }
 0x225   :  { %853 = vst [vmem:[#allocation12 + $0x1e0] sm:$0xff] %v628_v33  ;;  %v630_v53 = vadd.f32 %v629_v34, %v468_v30 }
 0x226   :  { %v770_v37 = vpop.f32.mrf.mxu1 }
 0x227   :  { %854 = vst [vmem:[#allocation12 + $0x1e8] sm:$0xff] %v630_v53  ;;  %v771_v38 = vadd.f32 %v770_v37, %v457_v36 }
 0x228   :  { %v772_v39 = vpop.f32.mrf.mxu1 }
 0x229   :  { %843 = vst [vmem:[#allocation12 + $0x190] sm:$0xff] %v771_v38  ;;  %v773_v44 = vadd.f32 %v772_v39, %v458_v56 }
 0x22a   :  { %v776_v46 = vpop.f32.mrf.mxu1 }
 0x22b   :  { %844 = vst [vmem:[#allocation12 + $0x198] sm:$0xff] %v773_v44  ;;  %v777_v40 = vadd.f32 %v776_v46, %v461_v41 }
 0x22c   :  { %v778_v59 = vpop.f32.mrf.mxu1 }
 0x22d   :  { %847 = vst [vmem:[#allocation12 + $0x1b0] sm:$0xff] %v777_v40  ;;  %v779_v49 = vadd.f32 %v778_v59, %v462_v58 }
 0x22e   :  { %v782_v52 = vpop.f32.mrf.mxu1 }
 0x22f   :  { %848 = vst [vmem:[#allocation12 + $0x1b8] sm:$0xff] %v779_v49  ;;  %v783_v55 = vadd.f32 %v782_v52, %v465_v47 }
 0x230   :  { %v784_v60 = vpop.f32.mrf.mxu1 }
 0x231   :  { %851 = vst [vmem:[#allocation12 + $0x1d0] sm:$0xff] %v783_v55  ;;  %v785_v62 = vadd.f32 %v784_v60, %v466_v54 }
 0x232   :  { %v788_v61 = vpop.f32.mrf.mxu1 }
 0x233   :  { %852 = vst [vmem:[#allocation12 + $0x1d8] sm:$0xff] %v785_v62  ;;  %v789_v3 = vadd.f32 %v788_v61, %v469_v57 }
 0x234   :  { %v790_v5 = vpop.f32.mrf.mxu1 }
 0x235   :  { %855 = vst [vmem:[#allocation12 + $0x1f0] sm:$0xff] %v789_v3  ;;  %v791_v0 = vadd.f32 %v790_v5, %v470_v63 }
 0x237   :  { %856 = vst [vmem:[#allocation12 + $0x1f8] sm:$0xff] %v791_v0 }
 0x238   :  { %1156 = shalt.err (!%p1153_p6)
}
 0x239   :  { %880 = dma.vmem_to_hbm [thread:$0]  %s875_s29, 8192, %s1477_s7, [#allocation13], %s1179_s11, %s1179_s11, %s1180_s12  }
 0x23a   :  { %1171 = dma.done.wait [#allocation4], 2048  }
 0x23b   :  { %1172 = vsyncadd [#allocation4], 4294965248 }
 0x23c   :  { %1173 = dma.done.wait [#allocation13], 8192  }
 0x23d   :  { %1174 = vsyncadd [#allocation13], 4294959104 }
 0x23e   :  { %887 = vsyncpa [#allocation3], 1 }
 0x23f   :  { %888 = vsyncpa [#allocation6], 1 }
 0x240   :  { %889 = vsyncpa [#allocation9], 1 }
 0x241   :  { %890 = vsyncpa [#allocation4], 1 }
 0x242   :  { %891 = vsyncpa [#allocation13], 1 }

// kernel: tpu_custom_call.1
= control target key start
LH: loop header
LB: loop body
LE: loop exit
PB: predicated region body
PF: predicated region fallthrough
CT: control target
= control target key end

     0   :  { %13 = vsyncpa [#allocation3], 0  ;;  %s1470_s0 = inlined_call_operand.hbm [shape: f32[128,128], index: 0, kind: input, shape index: {}]   ;;  %s1471_s1 = inlined_call_operand.hbm [shape: f32[128,128], index: 1, kind: input, shape index: {}]   ;;  %s1472_s2 = inlined_call_operand.hbm [shape: f32[128,128], index: 2, kind: input, shape index: {}]   ;;  %s1473_s3 = inlined_call_operand.vmem [shape: f32[1,128], index: 3, kind: input, shape index: {}]   ;;  %s1474_s4 = inlined_call_operand.hbm [shape: f32[128,512], index: 4, kind: input, shape index: {}]   ;;  %s1475_s5 = inlined_call_operand.hbm [shape: f32[128,512], index: 5, kind: input, shape index: {}]   ;;  %s1476_s6 = inlined_call_operand.hbm [shape: f32[128,128], index: 6, kind: output, shape index: {0}]   ;;  %s1477_s7 = inlined_call_operand.hbm [shape: f32[128,512], index: 7, kind: output, shape index: {1}]  }
   0x1   :  { %14 = vsyncpa [#allocation6], 0 }
   0x2   :  { %15 = vsyncpa [#allocation9], 0 }
   0x3   :  { %16 = vsyncpa [#allocation4], 0 }
   0x4   :  { %17 = vsyncpa [#allocation13], 0  ;;  %s1175_s24 = smov [#allocation5]   ;;  %s1176_s26 = smov [#allocation8]  }
   0x5   :  { %s35_s25 = sshll.u32 %s1175_s24, 4  ;;  %s61_s27 = sshll.u32 %s1176_s26, 4  ;;  %s36_s25 = int_to_ptr.vmem [resolvable:$true] %s35_s25  ;;  %s62_s27 = int_to_ptr.vmem [resolvable:$true] %s61_s27 }
   0x6   :  { %s1033_s28 = scalar_lea.vmem %s36_s25, 2048  ;;  %p1038_p1 = scmp.lt.s32.totalorder %s36_s25, %s36_s25 }
   0x7   :  { %p1034_p0 = scmp.ne.s32.totalorder %s36_s25, %s1033_s28  ;;  %p1039_p2 = scmp.lt.s32.totalorder %s1033_s28, %s1033_s28 }
   0x9   :  { %p1040_p3 = por %p1039_p2, %p1038_p1 }
   0xb   :  { %p1041_p4 = pnand %p1040_p3, %p1034_p0 }
   0xd   :  { %1044 = shalt.err (!%p1041_p4)
}
   0xe   :  { %s1177_s29 = smov 128   ;;  %s1178_s30 = smov 8  }
   0xf   :  { %41 = dma.hbm_to_vmem [thread:$0]  %s1471_s1, 2048, %s36_s25, [#allocation6], %s1177_s29, %s1177_s29, %s1178_s30  }
  0x10   :  { %s1053_s10 = scalar_lea.vmem %s62_s27, 8192  ;;  %p1058_p6 = scmp.lt.s32.totalorder %s62_s27, %s62_s27 }
  0x11   :  { %p1054_p5 = scmp.ne.s32.totalorder %s62_s27, %s1053_s10  ;;  %p1059_p7 = scmp.lt.s32.totalorder %s1053_s10, %s1053_s10 }
  0x13   :  { %p1060_p8 = por %p1059_p7, %p1058_p6 }
  0x15   :  { %p1061_p9 = pnand %p1060_p8, %p1054_p5 }
  0x17   :  { %1064 = shalt.err (!%p1061_p9)
}
  0x18   :  { %s1179_s11 = smov 512   ;;  %s1180_s12 = smov 32  }
  0x19   :  { %67 = dma.hbm_to_vmem [thread:$0]  %s1474_s4, 8192, %s62_s27, [#allocation9], %s1179_s11, %s1179_s11, %s1180_s12  }
  0x1a   :  { %s1181_s15 = smov [#allocation2]   ;;  %s1182_s17 = smov [#allocation7]  }
  0x1b   :  { %s23_s16 = sshll.u32 %s1181_s15, 4  ;;  %s47_s1 = sshll.u32 %s1182_s17, 4  ;;  %s24_s16 = int_to_ptr.vmem [resolvable:$true] %s23_s16  ;;  %s48_s1 = int_to_ptr.vmem [resolvable:$true] %s47_s1 }
  0x1c   :  { %s1073_s18 = scalar_lea.vmem %s24_s16, 2048  ;;  %p1078_p11 = scmp.lt.s32.totalorder %s24_s16, %s24_s16 }
  0x1d   :  { %p1074_p10 = scmp.ne.s32.totalorder %s24_s16, %s1073_s18  ;;  %p1079_p12 = scmp.lt.s32.totalorder %s1073_s18, %s1073_s18 }
  0x1f   :  { %p1080_p13 = por %p1079_p12, %p1078_p11 }
  0x21   :  { %p1081_p0 = pnand %p1080_p13, %p1074_p10 }
  0x23   :  { %1084 = shalt.err (!%p1081_p0)
}
  0x24   :  { %29 = dma.hbm_to_vmem [thread:$0]  %s1470_s0, 2048, %s24_s16, [#allocation3], %s1177_s29, %s1177_s29, %s1178_s30  }
  0x25   :  { %s1093_s4 = scalar_lea.vmem %s48_s1, 2048  ;;  %p1098_p2 = scmp.lt.s32.totalorder %s48_s1, %s48_s1 }
  0x26   :  { %p1094_p1 = scmp.ne.s32.totalorder %s48_s1, %s1093_s4  ;;  %p1099_p3 = scmp.lt.s32.totalorder %s1093_s4, %s1093_s4 }
  0x28   :  { %p1100_p4 = por %p1099_p3, %p1098_p2 }
  0x2a   :  { %p1101_p5 = pnand %p1100_p4, %p1094_p1 }
  0x2c   :  { %1104 = shalt.err (!%p1101_p5)
}
  0x2d   :  { %53 = dma.hbm_to_vmem [thread:$0]  %s1472_s2, 2048, %s48_s1, [#allocation6], %s1177_s29, %s1177_s29, %s1178_s30  }
  0x2e   :  { %s1183_s23 = smov [#allocation10]  }
  0x2f   :  { %s73_s24 = sshll.u32 %s1183_s23, 4  ;;  %s74_s24 = int_to_ptr.vmem [resolvable:$true] %s73_s24 }
  0x30   :  { %s1113_s25 = scalar_lea.vmem %s74_s24, 8192  ;;  %p1118_p7 = scmp.lt.s32.totalorder %s74_s24, %s74_s24 }
  0x31   :  { %p1114_p6 = scmp.ne.s32.totalorder %s74_s24, %s1113_s25  ;;  %p1119_p8 = scmp.lt.s32.totalorder %s1113_s25, %s1113_s25 }
  0x33   :  { %p1120_p9 = por %p1119_p8, %p1118_p7 }
  0x35   :  { %p1121_p10 = pnand %p1120_p9, %p1114_p6 }
  0x37   :  { %1124 = shalt.err (!%p1121_p10)
}
  0x38   :  { %79 = dma.hbm_to_vmem [thread:$0]  %s1475_s5, 8192, %s74_s24, [#allocation9], %s1179_s11, %s1179_s11, %s1180_s12  }
  0x39   :  { %1165 = dma.done.wait [#allocation3], 2048  }
  0x3a   :  { %1166 = vsyncadd [#allocation3], 4294965248 }
  0x3b   :  { %1167 = dma.done.wait [#allocation6], 4096  }
  0x3c   :  { %1168 = vsyncadd [#allocation6], 4294963200 }
  0x3d   :  { %1169 = dma.done.wait [#allocation9], 16384  }
  0x3e   :  { %1170 = vsyncadd [#allocation9], 4294950912  ;;  %v142_v0 = vld [vmem:[#allocation7 + $0x78] sm:$0xff]  ;;  %v141_v1 = vld [vmem:[#allocation7 + $0x70] sm:$0xff] }
  0x3f   :  { %925 = vmatprep.subr.mxu0 %v142_v0  ;;  %v140_v2 = vld [vmem:[#allocation7 + $0x68] sm:$0xff]  ;;  %v139_v3 = vld [vmem:[#allocation7 + $0x60] sm:$0xff]  ;;  %v138_v5 = vld [vmem:[#allocation7 + $0x58] sm:$0xff] }
  0x40   :  { %926 = vmatpush3.msra.mxu0 %v142_v0  ;;  %v111_v4 = vld [vmem:[#allocation5] sm:$0xff]  ;;  %v137_v6 = vld [vmem:[#allocation7 + $0x50] sm:$0xff]  ;;  %v136_v7 = vld [vmem:[#allocation7 + $0x48] sm:$0xff] }
  0x41   :  { %927 = vmatprep.subr.mxu0 %v141_v1  ;;  %957 = vmatprep.mubr.f32.mxu0 %v111_v4  ;;  %v404_v8 = vld [vmem:[#allocation8 + $0x1e8] sm:$0xff]  ;;  %v403_v9 = vld [vmem:[#allocation8 + $0x1e0] sm:$0xff]  ;;  %v134_v15 = vld [vmem:[#allocation7 + $0x38] sm:$0xff] }
  0x42   :  { %928 = vmatpush3.msra.mxu0 %v141_v1  ;;  %471 = vmatprep.subr.mxu1 %v404_v8  ;;  %v400_v10 = vld [vmem:[#allocation8 + $0x1c8] sm:$0xff]  ;;  %v135_v11 = vld [vmem:[#allocation7 + $0x40] sm:$0xff]  ;;  %v133_v18 = vld [vmem:[#allocation7 + $0x30] sm:$0xff] }
  0x43   :  { %929 = vmatprep.subr.mxu0 %v140_v2  ;;  %472 = vmatpush1.msra.mxu1 %v403_v9  ;;  %v399_v12 = vld [vmem:[#allocation8 + $0x1c0] sm:$0xff]  ;;  %v396_v13 = vld [vmem:[#allocation8 + $0x1a8] sm:$0xff]  ;;  %v130_v27 = vld [vmem:[#allocation7 + $0x18] sm:$0xff] }
  0x44   :  { %930 = vmatpush3.msra.mxu0 %v140_v2  ;;  %473 = vmatprep.subr.mxu1 %v400_v10  ;;  %v395_v14 = vld [vmem:[#allocation8 + $0x1a0] sm:$0xff]  ;;  %v392_v16 = vld [vmem:[#allocation8 + $0x188] sm:$0xff]  ;;  %v129_v30 = vld [vmem:[#allocation7 + $0x10] sm:$0xff] }
  0x45   :  { %931 = vmatprep.subr.mxu0 %v139_v3  ;;  %474 = vmatpush1.msra.mxu1 %v399_v12  ;;  %v391_v17 = vld [vmem:[#allocation8 + $0x180] sm:$0xff]  ;;  %v388_v19 = vld [vmem:[#allocation8 + $0x168] sm:$0xff]  ;;  %v1257_v40 = vld [vmem:[#allocation8 + $0x1f8] sm:$0xff] }
  0x46   :  { %932 = vmatpush3.msra.mxu0 %v139_v3  ;;  %475 = vmatprep.subr.mxu1 %v396_v13  ;;  %v387_v20 = vld [vmem:[#allocation8 + $0x160] sm:$0xff]  ;;  %v132_v21 = vld [vmem:[#allocation7 + $0x28] sm:$0xff]  ;;  %v113_v41 = vld [vmem:[#allocation5 + $0x10] sm:$0xff] }
  0x47   :  { %933 = vmatprep.subr.mxu0 %v138_v5  ;;  %476 = vmatpush1.msra.mxu1 %v395_v14  ;;  %v384_v22 = vld [vmem:[#allocation8 + $0x148] sm:$0xff]  ;;  %v383_v23 = vld [vmem:[#allocation8 + $0x140] sm:$0xff]  ;;  %v1259_v42 = vld [vmem:[#allocation8 + $0x1f0] sm:$0xff] }
  0x48   :  { %934 = vmatpush3.msra.mxu0 %v138_v5  ;;  %477 = vmatprep.subr.mxu1 %v392_v16  ;;  %v131_v24 = vld [vmem:[#allocation7 + $0x20] sm:$0xff]  ;;  %v380_v25 = vld [vmem:[#allocation8 + $0x128] sm:$0xff]  ;;  %v1261_v43 = vld [vmem:[#allocation8 + $0x1d8] sm:$0xff] }
  0x49   :  { %935 = vmatprep.subr.mxu0 %v137_v6  ;;  %478 = vmatpush1.msra.mxu1 %v391_v17  ;;  %v379_v26 = vld [vmem:[#allocation8 + $0x120] sm:$0xff]  ;;  %v376_v28 = vld [vmem:[#allocation8 + $0x108] sm:$0xff]  ;;  %v1264_v45 = vld [vmem:[#allocation8 + $0x1d0] sm:$0xff] }
  0x4a   :  { %936 = vmatpush3.msra.mxu0 %v137_v6  ;;  %479 = vmatprep.subr.mxu1 %v388_v19  ;;  %v375_v29 = vld [vmem:[#allocation8 + $0x100] sm:$0xff]  ;;  %v372_v31 = vld [vmem:[#allocation8 + $0xe8] sm:$0xff]  ;;  %v114_v47 = vld [vmem:[#allocation5 + $0x18] sm:$0xff] }
  0x4b   :  { %937 = vmatprep.subr.mxu0 %v136_v7  ;;  %480 = vmatpush1.msra.mxu1 %v387_v20  ;;  %v371_v32 = vld [vmem:[#allocation8 + $0xe0] sm:$0xff]  ;;  %v128_v33 = vld [vmem:[#allocation7 + $0x8] sm:$0xff]  ;;  %v1267_v48 = vld [vmem:[#allocation8 + $0x1b8] sm:$0xff] }
  0x4c   :  { %938 = vmatpush3.msra.mxu0 %v136_v7  ;;  %481 = vmatprep.subr.mxu1 %v384_v22  ;;  %v368_v34 = vld [vmem:[#allocation8 + $0xc8] sm:$0xff]  ;;  %v367_v35 = vld [vmem:[#allocation8 + $0xc0] sm:$0xff]  ;;  %v1270_v50 = vld [vmem:[#allocation8 + $0x1b0] sm:$0xff] }
  0x4d   :  { %939 = vmatprep.subr.mxu0 %v135_v11  ;;  %482 = vmatpush1.msra.mxu1 %v383_v23  ;;  %v127_v36 = vld [vmem:[#allocation7] sm:$0xff]  ;;  %v364_v37 = vld [vmem:[#allocation8 + $0xa8] sm:$0xff]  ;;  %v1273_v51 = vld [vmem:[#allocation8 + $0x198] sm:$0xff] }
  0x4e   :  { %940 = vmatpush3.msra.mxu0 %v135_v11  ;;  %483 = vmatprep.subr.mxu1 %v380_v25  ;;  %v363_v38 = vld [vmem:[#allocation8 + $0xa0] sm:$0xff]  ;;  %v112_v39 = vld [vmem:[#allocation5 + $0x8] sm:$0xff]  ;;  %v1276_v53 = vld [vmem:[#allocation8 + $0x190] sm:$0xff] }
  0x4f   :  { %941 = vmatprep.subr.mxu0 %v134_v15  ;;  %484 = vmatpush1.msra.mxu1 %v379_v26  ;;  %v360_v44 = vld [vmem:[#allocation8 + $0x88] sm:$0xff]  ;;  %v359_v46 = vld [vmem:[#allocation8 + $0x80] sm:$0xff]  ;;  %v1279_v56 = vld [vmem:[#allocation8 + $0x178] sm:$0xff] }
  0x50   :  { %942 = vmatpush3.msra.mxu0 %v134_v15  ;;  %485 = vmatprep.subr.mxu1 %v376_v28  ;;  %v115_v49 = vld [vmem:[#allocation5 + $0x20] sm:$0xff]  ;;  %v356_v52 = vld [vmem:[#allocation8 + $0x68] sm:$0xff]  ;;  %v117_v57 = vld [vmem:[#allocation5 + $0x30] sm:$0xff] }
  0x51   :  { %943 = vmatprep.subr.mxu0 %v133_v18  ;;  %486 = vmatpush1.msra.mxu1 %v375_v29  ;;  %v355_v54 = vld [vmem:[#allocation8 + $0x60] sm:$0xff]  ;;  %v116_v55 = vld [vmem:[#allocation5 + $0x28] sm:$0xff]  ;;  %v1282_v58 = vld [vmem:[#allocation8 + $0x170] sm:$0xff] }
  0x52   :  { %944 = vmatpush3.msra.mxu0 %v133_v18  ;;  %487 = vmatprep.subr.mxu1 %v372_v31  ;;  %v1285_v59 = vld [vmem:[#allocation8 + $0x158] sm:$0xff]  ;;  %v1288_v60 = vld [vmem:[#allocation8 + $0x150] sm:$0xff]  ;;  %v119_v63 = vld [vmem:[#allocation5 + $0x40] sm:$0xff] }
  0x53   :  { %945 = vmatprep.subr.mxu0 %v132_v21  ;;  %488 = vmatpush1.msra.mxu1 %v371_v32  ;;  %v118_v61 = vld [vmem:[#allocation5 + $0x38] sm:$0xff]  ;;  %v1294_v0 = vld [vmem:[#allocation8 + $0x130] sm:$0xff]  ;;  %v120_v3 = vld [vmem:[#allocation5 + $0x48] sm:$0xff]  ;;  %v1184_v32 = vmov 0.0  }
  0x54   :  { %946 = vmatpush3.msra.mxu0 %v132_v21  ;;  %489 = vmatprep.subr.mxu1 %v368_v34  ;;  %v1291_v62 = vld [vmem:[#allocation8 + $0x138] sm:$0xff]  ;;  %v1300_v2 = vld [vmem:[#allocation8 + $0x110] sm:$0xff]  ;;  %v123_v11 = vld [vmem:[#allocation5 + $0x60] sm:$0xff] }
  0x55   :  { %947 = vmatprep.subr.mxu0 %v131_v24  ;;  %490 = vmatpush1.msra.mxu1 %v367_v35  ;;  %v1297_v1 = vld [vmem:[#allocation8 + $0x118] sm:$0xff]  ;;  %v121_v5 = vld [vmem:[#allocation5 + $0x50] sm:$0xff]  ;;  %v124_v15 = vld [vmem:[#allocation5 + $0x68] sm:$0xff] }
  0x56   :  { %948 = vmatpush3.msra.mxu0 %v131_v24  ;;  %491 = vmatprep.subr.mxu1 %v364_v37  ;;  %v1303_v4 = vld [vmem:[#allocation8 + $0xf8] sm:$0xff]  ;;  %v1306_v6 = vld [vmem:[#allocation8 + $0xf0] sm:$0xff]  ;;  %v352_v20 = vld [vmem:[#allocation8 + $0x48] sm:$0xff] }
  0x57   :  { %949 = vmatprep.subr.mxu0 %v130_v27  ;;  %492 = vmatpush1.msra.mxu1 %v363_v38  ;;  %v1309_v7 = vld [vmem:[#allocation8 + $0xd8] sm:$0xff]  ;;  %v1312_v8 = vld [vmem:[#allocation8 + $0xd0] sm:$0xff]  ;;  %v351_v22 = vld [vmem:[#allocation8 + $0x40] sm:$0xff] }
  0x58   :  { %950 = vmatpush3.msra.mxu0 %v130_v27  ;;  %493 = vmatprep.subr.mxu1 %v360_v44  ;;  %v122_v9 = vld [vmem:[#allocation5 + $0x58] sm:$0xff]  ;;  %v1318_v12 = vld [vmem:[#allocation8 + $0xb0] sm:$0xff]  ;;  %v348_v24 = vld [vmem:[#allocation8 + $0x28] sm:$0xff] }
  0x59   :  { %951 = vmatprep.subr.mxu0 %v129_v30  ;;  %494 = vmatpush1.msra.mxu1 %v359_v46  ;;  %v1315_v10 = vld [vmem:[#allocation8 + $0xb8] sm:$0xff]  ;;  %v1324_v14 = vld [vmem:[#allocation8 + $0x90] sm:$0xff]  ;;  %v347_v26 = vld [vmem:[#allocation8 + $0x20] sm:$0xff] }
  0x5a   :  { %952 = vmatpush3.msra.mxu0 %v129_v30  ;;  %495 = vmatprep.subr.mxu1 %v356_v52  ;;  %v1321_v13 = vld [vmem:[#allocation8 + $0x98] sm:$0xff]  ;;  %v125_v17 = vld [vmem:[#allocation5 + $0x70] sm:$0xff]  ;;  %v344_v28 = vld [vmem:[#allocation8 + $0x8] sm:$0xff] }
  0x5b   :  { %953 = vmatprep.subr.mxu0 %v128_v33  ;;  %496 = vmatpush1.msra.mxu1 %v355_v54  ;;  %v1327_v16 = vld [vmem:[#allocation8 + $0x78] sm:$0xff]  ;;  %v1332_v19 = vld [vmem:[#allocation8 + $0x70] sm:$0xff]  ;;  %v343_v30 = vld [vmem:[#allocation8] sm:$0xff] }
  0x5c   :  { %954 = vmatpush3.msra.mxu0 %v128_v33  ;;  %v126_v18 = vld [vmem:[#allocation5 + $0x78] sm:$0xff]  ;;  %497 = vmatprep.subr.mxu1 %v352_v20  ;;  %v1338_v23 = vld [vmem:[#allocation8 + $0x50] sm:$0xff]  ;;  %v96_v33 = vld [vmem:[#allocation2 + $0x8] sm:$0xff] }
  0x5d   :  { %955 = vmatprep.subr.mxu0 %v127_v36  ;;  %v1335_v21 = vld [vmem:[#allocation8 + $0x58] sm:$0xff]  ;;  %498 = vmatpush1.msra.mxu1 %v351_v22  ;;  %v1344_v27 = vld [vmem:[#allocation8 + $0x30] sm:$0xff]  ;;  %v1359_v35 = vld [vmem:[%s1473_s3] ss:$0 sm:$0xff]  ;;  %s1185_s3 = smov [#allocation11]  }
  0x5e   :  { %956 = vmatpush3.msra.mxu0 %v127_v36  ;;  %v1341_v25 = vld [vmem:[#allocation8 + $0x38] sm:$0xff]  ;;  %499 = vmatprep.subr.mxu1 %v348_v24  ;;  %v1350_v31 = vld [vmem:[#allocation8 + $0x10] sm:$0xff]  ;;  %v95_v36 = vld [vmem:[#allocation2] sm:$0xff]  ;;  %s862_s27 = sshll.u32 %s1185_s3, 4  ;;  %s863_s27 = int_to_ptr.vmem [resolvable:$true] %s862_s27 }
  0x5f   :  { %958 = vmatmul.mubr.f32.vlgmr.msra.gmra.mxu0 %v112_v39  ;;  %632 = vmatprep.subr.mxu0 %v1257_v40  ;;  %v1347_v29 = vld [vmem:[#allocation8 + $0x18] sm:$0xff]  ;;  %v100_v54 = vld [vmem:[#allocation2 + $0x28] sm:$0xff]  ;;  %s1125_s28 = scalar_lea.vmem %s863_s27, 2048  ;;  %p1130_p12 = scmp.lt.s32.totalorder %s863_s27, %s863_s27 }
  0x60   :  { %960 = vmatprep.mubr.f32.mxu0 %v113_v41  ;;  %633 = vmatpush1.msra.mxu0 %v1259_v42  ;;  %v98_v39 = vld [vmem:[#allocation2 + $0x18] sm:$0xff]  ;;  %v104_v22 = vld [vmem:[#allocation2 + $0x48] sm:$0xff]  ;;  %p1126_p11 = scmp.ne.s32.totalorder %s863_s27, %s1125_s28  ;;  %p1131_p13 = scmp.lt.s32.totalorder %s1125_s28, %s1125_s28 }
  0x61   :  { %634 = vmatprep.subr.mxu0 %v1261_v43  ;;  %500 = vmatpush1.msra.mxu1 %v347_v26 }
  0x62   :  { %635 = vmatpush1.msra.mxu0 %v1264_v45  ;;  %501 = vmatprep.subr.mxu1 %v344_v28  ;;  %p1132_p0 = por %p1131_p13, %p1130_p12 }
  0x63   :  { %961 = vmatmul.mubr.f32.gmra.mxu0 %v114_v47  ;;  %636 = vmatprep.subr.mxu0 %v1267_v48 }
  0x64   :  { %963 = vmatprep.mubr.f32.mxu0 %v115_v49  ;;  %637 = vmatpush1.msra.mxu0 %v1270_v50  ;;  %p1133_p1 = pnand %p1132_p0, %p1126_p11 }
  0x65   :  { %638 = vmatprep.subr.mxu0 %v1273_v51  ;;  %502 = vmatpush1.msra.mxu1 %v343_v30 }
  0x66   :  { %639 = vmatpush1.msra.mxu0 %v1276_v53  ;;  %535 = vmatprep.mubr.f32.mxu1 %v1184_v32 }
  0x67   :  { %964 = vmatmul.mubr.f32.gmra.mxu0 %v116_v55  ;;  %640 = vmatprep.subr.mxu0 %v1279_v56 }
  0x68   :  { %966 = vmatprep.mubr.f32.mxu0 %v117_v57  ;;  %641 = vmatpush1.msra.mxu0 %v1282_v58 }
  0x69   :  { %642 = vmatprep.subr.mxu0 %v1285_v59  ;;  %981 = vmatprep.subr.mxu1 %v1257_v40  ;;  %v97_v40 = vld [vmem:[#allocation2 + $0x10] sm:$0xff] }
  0x6a   :  { %643 = vmatpush1.msra.mxu0 %v1288_v60 }
  0x6b   :  { %967 = vmatmul.mubr.f32.gmra.mxu0 %v118_v61  ;;  %644 = vmatprep.subr.mxu0 %v1291_v62 }
  0x6c   :  { %969 = vmatprep.mubr.f32.mxu0 %v119_v63  ;;  %645 = vmatpush1.msra.mxu0 %v1294_v0  ;;  %v99_v63 = vld [vmem:[#allocation2 + $0x20] sm:$0xff] }
  0x6d   :  { %646 = vmatprep.subr.mxu0 %v1297_v1 }
  0x6e   :  { %647 = vmatpush1.msra.mxu0 %v1300_v2 }
  0x6f   :  { %970 = vmatmul.mubr.f32.gmra.mxu0 %v120_v3  ;;  %648 = vmatprep.subr.mxu0 %v1303_v4 }
  0x70   :  { %972 = vmatprep.mubr.f32.mxu0 %v121_v5  ;;  %649 = vmatpush1.msra.mxu0 %v1306_v6 }
  0x71   :  { %650 = vmatprep.subr.mxu0 %v1309_v7 }
  0x72   :  { %651 = vmatpush1.msra.mxu0 %v1312_v8 }
  0x73   :  { %973 = vmatmul.mubr.f32.gmra.mxu0 %v122_v9  ;;  %652 = vmatprep.subr.mxu0 %v1315_v10 }
  0x74   :  { %975 = vmatprep.mubr.f32.mxu0 %v123_v11  ;;  %653 = vmatpush1.msra.mxu0 %v1318_v12  ;;  %v102_v11 = vld [vmem:[#allocation2 + $0x38] sm:$0xff] }
  0x75   :  { %654 = vmatprep.subr.mxu0 %v1321_v13 }
  0x76   :  { %655 = vmatpush1.msra.mxu0 %v1324_v14 }
  0x77   :  { %976 = vmatmul.mubr.f32.gmra.mxu0 %v124_v15  ;;  %656 = vmatprep.subr.mxu0 %v1327_v16 }
  0x78   :  { %978 = vmatprep.mubr.f32.mxu0 %v125_v17  ;;  %657 = vmatpush1.msra.mxu0 %v1332_v19 }
  0x79   :  { %658 = vmatprep.subr.mxu0 %v1335_v21 }
  0x7a   :  { %659 = vmatpush1.msra.mxu0 %v1338_v23 }
  0x7b   :  { %979 = vmatmul.mubr.f32.gmra.mxu0 %v126_v18  ;;  %660 = vmatprep.subr.mxu0 %v1341_v25  ;;  %v101_v18 = vld [vmem:[#allocation2 + $0x30] sm:$0xff] }
  0x7c   :  { %661 = vmatpush1.msra.mxu0 %v1344_v27  ;;  %696 = vmatprep.mubr.f32.mxu0 %v1184_v32 }
  0x7d   :  { %662 = vmatprep.subr.mxu0 %v1347_v29 }
  0x7e   :  { %663 = vmatpush1.msra.mxu0 %v1350_v31 }
 0x11f   :  { %v959_v34 = vpop.f32.mrf.mxu0 }
 0x120   :  { %v289_v37 = vadd.f32 %v959_v34, %v96_v33  ;;  %v106_v33 = vld [vmem:[#allocation2 + $0x58] sm:$0xff] }
 0x121   :  { %v209_v38 = vpop.f32.mrf.mxu0 }
 0x122   :  { %v312_v41 = vadd.f32 %v1359_v35, %v289_v37  ;;  %v288_v44 = vadd.f32 %v209_v38, %v95_v36  ;;  %v105_v37 = vld [vmem:[#allocation2 + $0x50] sm:$0xff] }
 0x123   :  { %v962_v46 = vpop.f32.mrf.mxu0 }
 0x124   :  { %328 = vst [vmem:[#allocation11 + $0x8] sm:$0xff] %v312_v41  ;;  %v311_v47 = vadd.f32 %v1359_v35, %v288_v44  ;;  %v291_v49 = vadd.f32 %v962_v46, %v98_v39 }
 0x125   :  { %v219_v52 = vpop.f32.mrf.mxu0 }
 0x126   :  { %327 = vst [vmem:[#allocation11] sm:$0xff] %v311_v47  ;;  %v314_v55 = vadd.f32 %v1359_v35, %v291_v49  ;;  %536 = vmatmul.mubr.f32.vlgmr.msra.gmra.mxu1 %v311_v47  ;;  %697 = vmatmul.mubr.f32.vlgmr.msra.gmra.mxu0 %v311_v47  ;;  %v290_v57 = vadd.f32 %v219_v52, %v97_v40  ;;  %v107_v40 = vld [vmem:[#allocation2 + $0x60] sm:$0xff]  ;;  %v110_v52 = vld [vmem:[#allocation2 + $0x78] sm:$0xff] }
 0x127   :  { %997 = vmatpush1.msra.mxu1 %v1259_v42  ;;  %541 = vmatprep.mubr.f32.mxu1 %v1184_v32  ;;  %v965_v61 = vpop.f32.mrf.mxu0 }
 0x128   :  { %330 = vst [vmem:[#allocation11 + $0x18] sm:$0xff] %v314_v55  ;;  %v313_v3 = vadd.f32 %v1359_v35, %v290_v57  ;;  %982 = vmatprep.subr.mxu1 %v1261_v43  ;;  %702 = vmatprep.mubr.f32.mxu0 %v1184_v32  ;;  %v293_v5 = vadd.f32 %v965_v61, %v100_v54  ;;  %v109_v57 = vld [vmem:[#allocation2 + $0x70] sm:$0xff] }
 0x129   :  { %998 = vmatpush1.msra.mxu1 %v1264_v45  ;;  %v229_v9 = vpop.f32.mrf.mxu0 }
 0x12a   :  { %329 = vst [vmem:[#allocation11 + $0x10] sm:$0xff] %v313_v3  ;;  %542 = vmatmul.mubr.f32.gmra.mxu1 %v312_v41  ;;  %703 = vmatmul.mubr.f32.gmra.mxu0 %v312_v41  ;;  %v316_v42 = vadd.f32 %v1359_v35, %v293_v5  ;;  %v292_v15 = vadd.f32 %v229_v9, %v99_v63  ;;  %v108_v41 = vld [vmem:[#allocation2 + $0x68] sm:$0xff] }
 0x12b   :  { %547 = vmatprep.mubr.f32.mxu1 %v1184_v32  ;;  %983 = vmatprep.subr.mxu1 %v1267_v48  ;;  %v968_v17 = vpop.f32.mrf.mxu0 }
 0x12c   :  { %332 = vst [vmem:[#allocation11 + $0x28] sm:$0xff] %v316_v42  ;;  %708 = vmatprep.mubr.f32.mxu0 %v1184_v32  ;;  %999 = vmatpush1.msra.mxu1 %v1270_v50  ;;  %v315_v43 = vadd.f32 %v1359_v35, %v292_v15  ;;  %v295_v45 = vadd.f32 %v968_v17, %v102_v11  ;;  %v103_v50 = vld [vmem:[#allocation2 + $0x40] sm:$0xff] }
 0x12d   :  { %984 = vmatprep.subr.mxu1 %v1273_v51  ;;  %v239_v20 = vpop.f32.mrf.mxu0 }
 0x12e   :  { %548 = vmatmul.mubr.f32.gmra.mxu1 %v313_v3  ;;  %709 = vmatmul.mubr.f32.gmra.mxu0 %v313_v3  ;;  %331 = vst [vmem:[#allocation11 + $0x20] sm:$0xff] %v315_v43  ;;  %v1378_v24 = vadd.f32 %v1359_v35, %v295_v45  ;;  %v294_v48 = vadd.f32 %v239_v20, %v101_v18 }
 0x12f   :  { %553 = vmatprep.mubr.f32.mxu1 %v1184_v32  ;;  %714 = vmatprep.mubr.f32.mxu0 %v1184_v32  ;;  %v971_v26 = vpop.f32.mrf.mxu0 }
 0x130   :  { %1000 = vmatpush1.msra.mxu1 %v1276_v53  ;;  %334 = vst [vmem:[#allocation11 + $0x38] sm:$0xff] %v1378_v24  ;;  %v317_v51 = vadd.f32 %v1359_v35, %v294_v48  ;;  %v297_v28 = vadd.f32 %v971_v26, %v104_v22 }
 0x131   :  { %985 = vmatprep.subr.mxu1 %v1279_v56  ;;  %v249_v30 = vpop.f32.mrf.mxu0 }
 0x132   :  { %554 = vmatmul.mubr.f32.gmra.mxu1 %v314_v55  ;;  %715 = vmatmul.mubr.f32.gmra.mxu0 %v314_v55  ;;  %333 = vst [vmem:[#allocation11 + $0x30] sm:$0xff] %v317_v51  ;;  %v1387_v34 = vadd.f32 %v1359_v35, %v297_v28  ;;  %v296_v36 = vadd.f32 %v249_v30, %v103_v50 }
 0x133   :  { %559 = vmatprep.mubr.f32.mxu1 %v1184_v32  ;;  %720 = vmatprep.mubr.f32.mxu0 %v1184_v32  ;;  %v974_v53 = vpop.f32.mrf.mxu0 }
 0x134   :  { %1001 = vmatpush1.msra.mxu1 %v1282_v58  ;;  %336 = vst [vmem:[#allocation11 + $0x48] sm:$0xff] %v1387_v34  ;;  %v319_v56 = vadd.f32 %v1359_v35, %v296_v36  ;;  %v299_v38 = vadd.f32 %v974_v53, %v106_v33 }
 0x135   :  { %986 = vmatprep.subr.mxu1 %v1285_v59  ;;  %v259_v39 = vpop.f32.mrf.mxu0 }
 0x136   :  { %560 = vmatmul.mubr.f32.gmra.mxu1 %v315_v43  ;;  %721 = vmatmul.mubr.f32.gmra.mxu0 %v315_v43  ;;  %335 = vst [vmem:[#allocation11 + $0x40] sm:$0xff] %v319_v56  ;;  %v1396_v44 = vadd.f32 %v1359_v35, %v299_v38  ;;  %v298_v46 = vadd.f32 %v259_v39, %v105_v37 }
 0x137   :  { %565 = vmatprep.mubr.f32.mxu1 %v1184_v32  ;;  %726 = vmatprep.mubr.f32.mxu0 %v1184_v32  ;;  %v977_v58 = vpop.f32.mrf.mxu0 }
 0x138   :  { %1002 = vmatpush1.msra.mxu1 %v1288_v60  ;;  %338 = vst [vmem:[#allocation11 + $0x58] sm:$0xff] %v1396_v44  ;;  %v321_v59 = vadd.f32 %v1359_v35, %v298_v46  ;;  %v301_v47 = vadd.f32 %v977_v58, %v108_v41 }
 0x139   :  { %987 = vmatprep.subr.mxu1 %v1291_v62  ;;  %v269_v49 = vpop.f32.mrf.mxu0 }
 0x13a   :  { %566 = vmatmul.mubr.f32.gmra.mxu1 %v316_v42  ;;  %727 = vmatmul.mubr.f32.gmra.mxu0 %v316_v42  ;;  %337 = vst [vmem:[#allocation11 + $0x50] sm:$0xff] %v321_v59  ;;  %v1405_v54 = vadd.f32 %v1359_v35, %v301_v47  ;;  %v300_v55 = vadd.f32 %v269_v49, %v107_v40 }
 0x13b   :  { %571 = vmatprep.mubr.f32.mxu1 %v1184_v32  ;;  %732 = vmatprep.mubr.f32.mxu0 %v1184_v32  ;;  %v980_v60 = vpop.f32.mrf.mxu0 }
 0x13c   :  { %1003 = vmatpush1.msra.mxu1 %v1294_v0  ;;  %340 = vst [vmem:[#allocation11 + $0x68] sm:$0xff] %v1405_v54  ;;  %v323_v62 = vadd.f32 %v1359_v35, %v300_v55  ;;  %v303_v61 = vadd.f32 %v980_v60, %v110_v52 }
 0x13d   :  { %988 = vmatprep.subr.mxu1 %v1297_v1  ;;  %v279_v63 = vpop.f32.mrf.mxu0 }
 0x13e   :  { %572 = vmatmul.mubr.f32.gmra.mxu1 %v317_v51  ;;  %733 = vmatmul.mubr.f32.gmra.mxu0 %v317_v51  ;;  %339 = vst [vmem:[#allocation11 + $0x60] sm:$0xff] %v323_v62  ;;  %v326_v3 = vadd.f32 %v1359_v35, %v303_v61  ;;  %v302_v5 = vadd.f32 %v279_v63, %v109_v57 }
 0x13f   :  { %577 = vmatprep.mubr.f32.mxu1 %v1184_v32  ;;  %738 = vmatprep.mubr.f32.mxu0 %v1184_v32 }
 0x140   :  { %1004 = vmatpush1.msra.mxu1 %v1300_v2  ;;  %342 = vst [vmem:[#allocation11 + $0x78] sm:$0xff] %v326_v3  ;;  %v325_v0 = vadd.f32 %v1359_v35, %v302_v5 }
 0x141   :  { %989 = vmatprep.subr.mxu1 %v1303_v4 }
 0x142   :  { %578 = vmatmul.mubr.f32.gmra.mxu1 %v1378_v24  ;;  %739 = vmatmul.mubr.f32.gmra.mxu0 %v1378_v24  ;;  %341 = vst [vmem:[#allocation11 + $0x70] sm:$0xff] %v325_v0 }
 0x143   :  { %583 = vmatprep.mubr.f32.mxu1 %v1184_v32  ;;  %744 = vmatprep.mubr.f32.mxu0 %v1184_v32 }
 0x144   :  { %1005 = vmatpush1.msra.mxu1 %v1306_v6 }
 0x145   :  { %990 = vmatprep.subr.mxu1 %v1309_v7 }
 0x146   :  { %584 = vmatmul.mubr.f32.gmra.mxu1 %v319_v56  ;;  %745 = vmatmul.mubr.f32.gmra.mxu0 %v319_v56 }
 0x147   :  { %589 = vmatprep.mubr.f32.mxu1 %v1184_v32  ;;  %750 = vmatprep.mubr.f32.mxu0 %v1184_v32 }
 0x148   :  { %1006 = vmatpush1.msra.mxu1 %v1312_v8 }
 0x149   :  { %991 = vmatprep.subr.mxu1 %v1315_v10 }
 0x14a   :  { %590 = vmatmul.mubr.f32.gmra.mxu1 %v1387_v34  ;;  %751 = vmatmul.mubr.f32.gmra.mxu0 %v1387_v34 }
 0x14b   :  { %595 = vmatprep.mubr.f32.mxu1 %v1184_v32  ;;  %756 = vmatprep.mubr.f32.mxu0 %v1184_v32 }
 0x14c   :  { %1007 = vmatpush1.msra.mxu1 %v1318_v12 }
 0x14d   :  { %992 = vmatprep.subr.mxu1 %v1321_v13 }
 0x14e   :  { %596 = vmatmul.mubr.f32.gmra.mxu1 %v321_v59  ;;  %757 = vmatmul.mubr.f32.gmra.mxu0 %v321_v59 }
 0x14f   :  { %601 = vmatprep.mubr.f32.mxu1 %v1184_v32  ;;  %762 = vmatprep.mubr.f32.mxu0 %v1184_v32 }
 0x150   :  { %1008 = vmatpush1.msra.mxu1 %v1324_v14 }
 0x151   :  { %993 = vmatprep.subr.mxu1 %v1327_v16 }
 0x152   :  { %602 = vmatmul.mubr.f32.gmra.mxu1 %v1396_v44  ;;  %763 = vmatmul.mubr.f32.gmra.mxu0 %v1396_v44 }
 0x153   :  { %607 = vmatprep.mubr.f32.mxu1 %v1184_v32  ;;  %1009 = vmatpush1.msra.mxu1 %v1332_v19 }
 0x154   :  { %994 = vmatprep.subr.mxu1 %v1335_v21 }
 0x155   :  { %1010 = vmatpush1.msra.mxu1 %v1338_v23 }
 0x156   :  { %608 = vmatmul.mubr.f32.gmra.mxu1 %v323_v62  ;;  %995 = vmatprep.subr.mxu1 %v1341_v25 }
 0x157   :  { %613 = vmatprep.mubr.f32.mxu1 %v1184_v32  ;;  %1011 = vmatpush1.msra.mxu1 %v1344_v27 }
 0x158   :  { %996 = vmatprep.subr.mxu1 %v1347_v29 }
 0x159   :  { %1012 = vmatpush1.msra.mxu1 %v1350_v31 }
 0x15a   :  { %614 = vmatmul.mubr.f32.gmra.mxu1 %v1405_v54 }
 0x15b   :  { %619 = vmatprep.mubr.f32.mxu1 %v1184_v32 }
 0x15e   :  { %620 = vmatmul.mubr.f32.gmra.mxu1 %v325_v0 }
 0x15f   :  { %625 = vmatprep.mubr.f32.mxu1 %v1184_v32 }
 0x162   :  { %626 = vmatmul.mubr.f32.gmra.mxu1 %v326_v3 }
 0x163   :  { %768 = vmatprep.mubr.f32.mxu1 %v1184_v32 }
 0x166   :  { %769 = vmatmul.mubr.f32.vlgmr.msra.gmra.mxu1 %v323_v62 }
 0x167   :  { %774 = vmatprep.mubr.f32.mxu1 %v1184_v32 }
 0x16a   :  { %775 = vmatmul.mubr.f32.gmra.mxu1 %v1405_v54 }
 0x16b   :  { %780 = vmatprep.mubr.f32.mxu1 %v1184_v32 }
 0x16e   :  { %781 = vmatmul.mubr.f32.gmra.mxu1 %v325_v0 }
 0x16f   :  { %786 = vmatprep.mubr.f32.mxu1 %v1184_v32 }
 0x172   :  { %787 = vmatmul.mubr.f32.gmra.mxu1 %v326_v3 }
 0x173   :  { %1136 = shalt.err (!%p1133_p1)
}
 0x174   :  { %868 = dma.vmem_to_hbm [thread:$0]  %s863_s27, 2048, %s1476_s6, [#allocation4], %s1177_s29, %s1177_s29, %s1178_s30   ;;  %v407_v1 = vld [vmem:[#allocation10] sm:$0xff]  ;;  %v409_v2 = vld [vmem:[#allocation10 + $0x10] sm:$0xff]  ;;  %v408_v7 = vld [vmem:[#allocation10 + $0x8] sm:$0xff] }
 0x175   :  { %v410_v8 = vld [vmem:[#allocation10 + $0x18] sm:$0xff]  ;;  %v411_v16 = vld [vmem:[#allocation10 + $0x20] sm:$0xff]  ;;  %v413_v19 = vld [vmem:[#allocation10 + $0x30] sm:$0xff]  ;;  %s1186_s6 = smov [#allocation12]  }
 0x176   :  { %v412_v29 = vld [vmem:[#allocation10 + $0x28] sm:$0xff]  ;;  %v414_v31 = vld [vmem:[#allocation10 + $0x38] sm:$0xff]  ;;  %v415_v42 = vld [vmem:[#allocation10 + $0x40] sm:$0xff]  ;;  %s874_s29 = sshll.u32 %s1186_s6, 4  ;;  %s875_s29 = int_to_ptr.vmem [resolvable:$true] %s874_s29 }
 0x177   :  { %v417_v15 = vld [vmem:[#allocation10 + $0x50] sm:$0xff]  ;;  %v416_v20 = vld [vmem:[#allocation10 + $0x48] sm:$0xff]  ;;  %v418_v22 = vld [vmem:[#allocation10 + $0x58] sm:$0xff]  ;;  %s1145_s30 = scalar_lea.vmem %s875_s29, 8192  ;;  %p1150_p3 = scmp.lt.s32.totalorder %s875_s29, %s875_s29 }
 0x178   :  { %v419_v51 = vld [vmem:[#allocation10 + $0x60] sm:$0xff]  ;;  %v421_v28 = vld [vmem:[#allocation10 + $0x70] sm:$0xff]  ;;  %v420_v53 = vld [vmem:[#allocation10 + $0x68] sm:$0xff]  ;;  %p1146_p2 = scmp.ne.s32.totalorder %s875_s29, %s1145_s30  ;;  %p1151_p4 = scmp.lt.s32.totalorder %s1145_s30, %s1145_s30 }
 0x179   :  { %v422_v37 = vld [vmem:[#allocation10 + $0x78] sm:$0xff]  ;;  %v423_v44 = vld [vmem:[#allocation10 + $0x80] sm:$0xff]  ;;  %v425_v46 = vld [vmem:[#allocation10 + $0x90] sm:$0xff] }
 0x17a   :  { %v424_v49 = vld [vmem:[#allocation10 + $0x88] sm:$0xff]  ;;  %v426_v52 = vld [vmem:[#allocation10 + $0x98] sm:$0xff]  ;;  %v427_v62 = vld [vmem:[#allocation10 + $0xa0] sm:$0xff]  ;;  %p1152_p5 = por %p1151_p4, %p1150_p3 }
 0x17b   :  { %v429_v61 = vld [vmem:[#allocation10 + $0xb0] sm:$0xff] }
 0x17c   :  { %p1153_p6 = pnand %p1152_p5, %p1146_p2 }
 0x1e6   :  { %v537_v4 = vpop.f32.mrf.mxu1  ;;  %v698_v6 = vpop.f32.mrf.mxu0 }
 0x1e7   :  { %v538_v10 = vadd.f32 %v537_v4, %v407_v1  ;;  %v699_v12 = vadd.f32 %v698_v6, %v409_v2  ;;  %v428_v1 = vld [vmem:[#allocation10 + $0xa8] sm:$0xff]  ;;  %v430_v2 = vld [vmem:[#allocation10 + $0xb8] sm:$0xff] }
 0x1e8   :  { %v539_v13 = vpop.f32.mrf.mxu1  ;;  %v700_v14 = vpop.f32.mrf.mxu0 }
 0x1e9   :  { %793 = vst [vmem:[#allocation12] sm:$0xff] %v538_v10  ;;  %795 = vst [vmem:[#allocation12 + $0x10] sm:$0xff] %v699_v12  ;;  %v540_v21 = vadd.f32 %v539_v13, %v408_v7  ;;  %v701_v23 = vadd.f32 %v700_v14, %v410_v8  ;;  %v431_v10 = vld [vmem:[#allocation10 + $0xc0] sm:$0xff]  ;;  %v433_v12 = vld [vmem:[#allocation10 + $0xd0] sm:$0xff] }
 0x1ea   :  { %v543_v25 = vpop.f32.mrf.mxu1  ;;  %v704_v27 = vpop.f32.mrf.mxu0 }
 0x1eb   :  { %794 = vst [vmem:[#allocation12 + $0x8] sm:$0xff] %v540_v21  ;;  %796 = vst [vmem:[#allocation12 + $0x18] sm:$0xff] %v701_v23  ;;  %v544_v32 = vadd.f32 %v543_v25, %v411_v16  ;;  %v705_v35 = vadd.f32 %v704_v27, %v413_v19  ;;  %v432_v21 = vld [vmem:[#allocation10 + $0xc8] sm:$0xff]  ;;  %v434_v23 = vld [vmem:[#allocation10 + $0xd8] sm:$0xff] }
 0x1ec   :  { %v545_v9 = vpop.f32.mrf.mxu1  ;;  %v706_v11 = vpop.f32.mrf.mxu0 }
 0x1ed   :  { %797 = vst [vmem:[#allocation12 + $0x20] sm:$0xff] %v544_v32  ;;  %799 = vst [vmem:[#allocation12 + $0x30] sm:$0xff] %v705_v35  ;;  %v546_v17 = vadd.f32 %v545_v9, %v412_v29  ;;  %v707_v18 = vadd.f32 %v706_v11, %v414_v31  ;;  %v435_v32 = vld [vmem:[#allocation10 + $0xe0] sm:$0xff]  ;;  %v437_v35 = vld [vmem:[#allocation10 + $0xf0] sm:$0xff] }
 0x1ee   :  { %v549_v43 = vpop.f32.mrf.mxu1  ;;  %v710_v45 = vpop.f32.mrf.mxu0 }
 0x1ef   :  { %798 = vst [vmem:[#allocation12 + $0x28] sm:$0xff] %v546_v17  ;;  %800 = vst [vmem:[#allocation12 + $0x38] sm:$0xff] %v707_v18  ;;  %v550_v24 = vadd.f32 %v549_v43, %v415_v42  ;;  %v711_v48 = vadd.f32 %v710_v45, %v417_v15  ;;  %v436_v17 = vld [vmem:[#allocation10 + $0xe8] sm:$0xff]  ;;  %v438_v18 = vld [vmem:[#allocation10 + $0xf8] sm:$0xff] }
 0x1f0   :  { %v551_v26 = vpop.f32.mrf.mxu1  ;;  %v712_v50 = vpop.f32.mrf.mxu0 }
 0x1f1   :  { %801 = vst [vmem:[#allocation12 + $0x40] sm:$0xff] %v550_v24  ;;  %803 = vst [vmem:[#allocation12 + $0x50] sm:$0xff] %v711_v48  ;;  %v552_v30 = vadd.f32 %v551_v26, %v416_v20  ;;  %v713_v33 = vadd.f32 %v712_v50, %v418_v22  ;;  %v439_v24 = vld [vmem:[#allocation10 + $0x100] sm:$0xff]  ;;  %v441_v48 = vld [vmem:[#allocation10 + $0x110] sm:$0xff] }
 0x1f2   :  { %v555_v34 = vpop.f32.mrf.mxu1  ;;  %v716_v36 = vpop.f32.mrf.mxu0 }
 0x1f3   :  { %802 = vst [vmem:[#allocation12 + $0x48] sm:$0xff] %v552_v30  ;;  %804 = vst [vmem:[#allocation12 + $0x58] sm:$0xff] %v713_v33  ;;  %v556_v56 = vadd.f32 %v555_v34, %v419_v51  ;;  %v717_v38 = vadd.f32 %v716_v36, %v421_v28  ;;  %v440_v30 = vld [vmem:[#allocation10 + $0x108] sm:$0xff]  ;;  %v442_v33 = vld [vmem:[#allocation10 + $0x118] sm:$0xff] }
 0x1f4   :  { %v557_v39 = vpop.f32.mrf.mxu1  ;;  %v718_v41 = vpop.f32.mrf.mxu0 }
 0x1f5   :  { %805 = vst [vmem:[#allocation12 + $0x60] sm:$0xff] %v556_v56  ;;  %807 = vst [vmem:[#allocation12 + $0x70] sm:$0xff] %v717_v38  ;;  %v558_v58 = vadd.f32 %v557_v39, %v420_v53  ;;  %v719_v40 = vadd.f32 %v718_v41, %v422_v37  ;;  %v443_v56 = vld [vmem:[#allocation10 + $0x120] sm:$0xff]  ;;  %v445_v38 = vld [vmem:[#allocation10 + $0x130] sm:$0xff] }
 0x1f6   :  { %v561_v59 = vpop.f32.mrf.mxu1  ;;  %v722_v47 = vpop.f32.mrf.mxu0 }
 0x1f7   :  { %806 = vst [vmem:[#allocation12 + $0x68] sm:$0xff] %v558_v58  ;;  %808 = vst [vmem:[#allocation12 + $0x78] sm:$0xff] %v719_v40  ;;  %v562_v54 = vadd.f32 %v561_v59, %v423_v44  ;;  %v723_v55 = vadd.f32 %v722_v47, %v425_v46  ;;  %v444_v58 = vld [vmem:[#allocation10 + $0x128] sm:$0xff]  ;;  %v446_v40 = vld [vmem:[#allocation10 + $0x138] sm:$0xff] }
 0x1f8   :  { %v563_v60 = vpop.f32.mrf.mxu1  ;;  %v724_v57 = vpop.f32.mrf.mxu0 }
 0x1f9   :  { %809 = vst [vmem:[#allocation12 + $0x80] sm:$0xff] %v562_v54  ;;  %811 = vst [vmem:[#allocation12 + $0x90] sm:$0xff] %v723_v55  ;;  %v564_v63 = vadd.f32 %v563_v60, %v424_v49  ;;  %v725_v3 = vadd.f32 %v724_v57, %v426_v52  ;;  %v447_v54 = vld [vmem:[#allocation10 + $0x140] sm:$0xff]  ;;  %v449_v55 = vld [vmem:[#allocation10 + $0x150] sm:$0xff] }
 0x1fa   :  { %v567_v5 = vpop.f32.mrf.mxu1  ;;  %v728_v0 = vpop.f32.mrf.mxu0 }
 0x1fb   :  { %810 = vst [vmem:[#allocation12 + $0x88] sm:$0xff] %v564_v63  ;;  %812 = vst [vmem:[#allocation12 + $0x98] sm:$0xff] %v725_v3  ;;  %v568_v4 = vadd.f32 %v567_v5, %v427_v62  ;;  %v729_v6 = vadd.f32 %v728_v0, %v429_v61  ;;  %v448_v63 = vld [vmem:[#allocation10 + $0x148] sm:$0xff]  ;;  %v450_v3 = vld [vmem:[#allocation10 + $0x158] sm:$0xff] }
 0x1fc   :  { %v569_v7 = vpop.f32.mrf.mxu1  ;;  %v730_v8 = vpop.f32.mrf.mxu0 }
 0x1fd   :  { %813 = vst [vmem:[#allocation12 + $0xa0] sm:$0xff] %v568_v4  ;;  %815 = vst [vmem:[#allocation12 + $0xb0] sm:$0xff] %v729_v6  ;;  %v570_v13 = vadd.f32 %v569_v7, %v428_v1  ;;  %v731_v14 = vadd.f32 %v730_v8, %v430_v2  ;;  %v451_v4 = vld [vmem:[#allocation10 + $0x160] sm:$0xff]  ;;  %v453_v6 = vld [vmem:[#allocation10 + $0x170] sm:$0xff] }
 0x1fe   :  { %v573_v16 = vpop.f32.mrf.mxu1  ;;  %v734_v19 = vpop.f32.mrf.mxu0 }
 0x1ff   :  { %814 = vst [vmem:[#allocation12 + $0xa8] sm:$0xff] %v570_v13  ;;  %816 = vst [vmem:[#allocation12 + $0xb8] sm:$0xff] %v731_v14  ;;  %v574_v25 = vadd.f32 %v573_v16, %v431_v10  ;;  %v735_v27 = vadd.f32 %v734_v19, %v433_v12  ;;  %v452_v13 = vld [vmem:[#allocation10 + $0x168] sm:$0xff]  ;;  %v454_v14 = vld [vmem:[#allocation10 + $0x178] sm:$0xff] }
 0x200   :  { %v575_v29 = vpop.f32.mrf.mxu1  ;;  %v736_v31 = vpop.f32.mrf.mxu0 }
 0x201   :  { %817 = vst [vmem:[#allocation12 + $0xc0] sm:$0xff] %v574_v25  ;;  %819 = vst [vmem:[#allocation12 + $0xd0] sm:$0xff] %v735_v27  ;;  %v576_v9 = vadd.f32 %v575_v29, %v432_v21  ;;  %v737_v11 = vadd.f32 %v736_v31, %v434_v23  ;;  %v455_v25 = vld [vmem:[#allocation10 + $0x180] sm:$0xff] }
 0x202   :  { %v579_v42 = vpop.f32.mrf.mxu1  ;;  %v740_v15 = vpop.f32.mrf.mxu0 }
 0x203   :  { %818 = vst [vmem:[#allocation12 + $0xc8] sm:$0xff] %v576_v9  ;;  %820 = vst [vmem:[#allocation12 + $0xd8] sm:$0xff] %v737_v11  ;;  %v580_v43 = vadd.f32 %v579_v42, %v435_v32  ;;  %v741_v45 = vadd.f32 %v740_v15, %v437_v35  ;;  %v456_v32 = vld [vmem:[#allocation10 + $0x188] sm:$0xff]  ;;  %v459_v11 = vld [vmem:[#allocation10 + $0x1a0] sm:$0xff] }
 0x204   :  { %v581_v20 = vpop.f32.mrf.mxu1  ;;  %v742_v22 = vpop.f32.mrf.mxu0 }
 0x205   :  { %821 = vst [vmem:[#allocation12 + $0xe0] sm:$0xff] %v580_v43  ;;  %823 = vst [vmem:[#allocation12 + $0xf0] sm:$0xff] %v741_v45  ;;  %v582_v26 = vadd.f32 %v581_v20, %v436_v17  ;;  %v743_v50 = vadd.f32 %v742_v22, %v438_v18  ;;  %v460_v17 = vld [vmem:[#allocation10 + $0x1a8] sm:$0xff]  ;;  %v463_v45 = vld [vmem:[#allocation10 + $0x1c0] sm:$0xff] }
 0x206   :  { %v585_v51 = vpop.f32.mrf.mxu1  ;;  %v746_v28 = vpop.f32.mrf.mxu0 }
 0x207   :  { %822 = vst [vmem:[#allocation12 + $0xe8] sm:$0xff] %v582_v26  ;;  %824 = vst [vmem:[#allocation12 + $0xf8] sm:$0xff] %v743_v50  ;;  %v586_v34 = vadd.f32 %v585_v51, %v439_v24  ;;  %v747_v36 = vadd.f32 %v746_v28, %v441_v48  ;;  %v464_v24 = vld [vmem:[#allocation10 + $0x1c8] sm:$0xff]  ;;  %v467_v50 = vld [vmem:[#allocation10 + $0x1e0] sm:$0xff] }
 0x208   :  { %v587_v53 = vpop.f32.mrf.mxu1  ;;  %v748_v37 = vpop.f32.mrf.mxu0 }
 0x209   :  { %825 = vst [vmem:[#allocation12 + $0x100] sm:$0xff] %v586_v34  ;;  %827 = vst [vmem:[#allocation12 + $0x110] sm:$0xff] %v747_v36  ;;  %v588_v39 = vadd.f32 %v587_v53, %v440_v30  ;;  %v749_v41 = vadd.f32 %v748_v37, %v442_v33  ;;  %v468_v30 = vld [vmem:[#allocation10 + $0x1e8] sm:$0xff]  ;;  %v457_v36 = vld [vmem:[#allocation10 + $0x190] sm:$0xff] }
 0x20a   :  { %v591_v44 = vpop.f32.mrf.mxu1  ;;  %v752_v46 = vpop.f32.mrf.mxu0 }
 0x20b   :  { %826 = vst [vmem:[#allocation12 + $0x108] sm:$0xff] %v588_v39  ;;  %828 = vst [vmem:[#allocation12 + $0x118] sm:$0xff] %v749_v41  ;;  %v592_v59 = vadd.f32 %v591_v44, %v443_v56  ;;  %v753_v47 = vadd.f32 %v752_v46, %v445_v38  ;;  %v458_v56 = vld [vmem:[#allocation10 + $0x198] sm:$0xff]  ;;  %v461_v41 = vld [vmem:[#allocation10 + $0x1b0] sm:$0xff] }
 0x20c   :  { %v593_v49 = vpop.f32.mrf.mxu1  ;;  %v754_v52 = vpop.f32.mrf.mxu0 }
 0x20d   :  { %829 = vst [vmem:[#allocation12 + $0x120] sm:$0xff] %v592_v59  ;;  %831 = vst [vmem:[#allocation12 + $0x130] sm:$0xff] %v753_v47  ;;  %v594_v60 = vadd.f32 %v593_v49, %v444_v58  ;;  %v755_v57 = vadd.f32 %v754_v52, %v446_v40  ;;  %v462_v58 = vld [vmem:[#allocation10 + $0x1b8] sm:$0xff]  ;;  %v465_v47 = vld [vmem:[#allocation10 + $0x1d0] sm:$0xff] }
 0x20e   :  { %v597_v62 = vpop.f32.mrf.mxu1  ;;  %v758_v61 = vpop.f32.mrf.mxu0 }
 0x20f   :  { %830 = vst [vmem:[#allocation12 + $0x128] sm:$0xff] %v594_v60  ;;  %832 = vst [vmem:[#allocation12 + $0x138] sm:$0xff] %v755_v57  ;;  %v598_v5 = vadd.f32 %v597_v62, %v447_v54  ;;  %v759_v0 = vadd.f32 %v758_v61, %v449_v55  ;;  %v466_v54 = vld [vmem:[#allocation10 + $0x1d8] sm:$0xff]  ;;  %v469_v57 = vld [vmem:[#allocation10 + $0x1f0] sm:$0xff] }
 0x210   :  { %v599_v1 = vpop.f32.mrf.mxu1  ;;  %v760_v2 = vpop.f32.mrf.mxu0 }
 0x211   :  { %833 = vst [vmem:[#allocation12 + $0x140] sm:$0xff] %v598_v5  ;;  %835 = vst [vmem:[#allocation12 + $0x150] sm:$0xff] %v759_v0  ;;  %v600_v7 = vadd.f32 %v599_v1, %v448_v63  ;;  %v761_v8 = vadd.f32 %v760_v2, %v450_v3  ;;  %v470_v63 = vld [vmem:[#allocation10 + $0x1f8] sm:$0xff] }
 0x212   :  { %v603_v10 = vpop.f32.mrf.mxu1  ;;  %v764_v12 = vpop.f32.mrf.mxu0 }
 0x213   :  { %834 = vst [vmem:[#allocation12 + $0x148] sm:$0xff] %v600_v7  ;;  %836 = vst [vmem:[#allocation12 + $0x158] sm:$0xff] %v761_v8  ;;  %v604_v16 = vadd.f32 %v603_v10, %v451_v4  ;;  %v765_v19 = vadd.f32 %v764_v12, %v453_v6 }
 0x214   :  { %v605_v21 = vpop.f32.mrf.mxu1  ;;  %v766_v23 = vpop.f32.mrf.mxu0 }
 0x215   :  { %837 = vst [vmem:[#allocation12 + $0x160] sm:$0xff] %v604_v16  ;;  %839 = vst [vmem:[#allocation12 + $0x170] sm:$0xff] %v765_v19  ;;  %v606_v27 = vadd.f32 %v605_v21, %v452_v13  ;;  %v767_v29 = vadd.f32 %v766_v23, %v454_v14 }
 0x216   :  { %v609_v31 = vpop.f32.mrf.mxu1 }
 0x217   :  { %838 = vst [vmem:[#allocation12 + $0x168] sm:$0xff] %v606_v27  ;;  %840 = vst [vmem:[#allocation12 + $0x178] sm:$0xff] %v767_v29  ;;  %v610_v35 = vadd.f32 %v609_v31, %v455_v25 }
 0x218   :  { %v611_v9 = vpop.f32.mrf.mxu1 }
 0x219   :  { %841 = vst [vmem:[#allocation12 + $0x180] sm:$0xff] %v610_v35  ;;  %v612_v42 = vadd.f32 %v611_v9, %v456_v32 }
 0x21a   :  { %v615_v15 = vpop.f32.mrf.mxu1 }
 0x21b   :  { %842 = vst [vmem:[#allocation12 + $0x188] sm:$0xff] %v612_v42  ;;  %v616_v18 = vadd.f32 %v615_v15, %v459_v11 }
 0x21c   :  { %v617_v43 = vpop.f32.mrf.mxu1 }
 0x21d   :  { %845 = vst [vmem:[#allocation12 + $0x1a0] sm:$0xff] %v616_v18  ;;  %v618_v20 = vadd.f32 %v617_v43, %v460_v17 }
 0x21e   :  { %v621_v22 = vpop.f32.mrf.mxu1 }
 0x21f   :  { %846 = vst [vmem:[#allocation12 + $0x1a8] sm:$0xff] %v618_v20  ;;  %v622_v48 = vadd.f32 %v621_v22, %v463_v45 }
 0x220   :  { %v623_v26 = vpop.f32.mrf.mxu1 }
 0x221   :  { %849 = vst [vmem:[#allocation12 + $0x1c0] sm:$0xff] %v622_v48  ;;  %v624_v51 = vadd.f32 %v623_v26, %v464_v24 }
 0x222   :  { %v627_v28 = vpop.f32.mrf.mxu1 }
 0x223   :  { %850 = vst [vmem:[#allocation12 + $0x1c8] sm:$0xff] %v624_v51  ;;  %v628_v33 = vadd.f32 %v627_v28, %v467_v50 }
 0x224   :  { %v629_v34 = vpop.f32.mrf.mxu1 }
 0x225   :  { %853 = vst [vmem:[#allocation12 + $0x1e0] sm:$0xff] %v628_v33  ;;  %v630_v53 = vadd.f32 %v629_v34, %v468_v30 }
 0x226   :  { %v770_v37 = vpop.f32.mrf.mxu1 }
 0x227   :  { %854 = vst [vmem:[#allocation12 + $0x1e8] sm:$0xff] %v630_v53  ;;  %v771_v38 = vadd.f32 %v770_v37, %v457_v36 }
 0x228   :  { %v772_v39 = vpop.f32.mrf.mxu1 }
 0x229   :  { %843 = vst [vmem:[#allocation12 + $0x190] sm:$0xff] %v771_v38  ;;  %v773_v44 = vadd.f32 %v772_v39, %v458_v56 }
 0x22a   :  { %v776_v46 = vpop.f32.mrf.mxu1 }
 0x22b   :  { %844 = vst [vmem:[#allocation12 + $0x198] sm:$0xff] %v773_v44  ;;  %v777_v40 = vadd.f32 %v776_v46, %v461_v41 }
 0x22c   :  { %v778_v59 = vpop.f32.mrf.mxu1 }
 0x22d   :  { %847 = vst [vmem:[#allocation12 + $0x1b0] sm:$0xff] %v777_v40  ;;  %v779_v49 = vadd.f32 %v778_v59, %v462_v58 }
 0x22e   :  { %v782_v52 = vpop.f32.mrf.mxu1 }
 0x22f   :  { %848 = vst [vmem:[#allocation12 + $0x1b8] sm:$0xff] %v779_v49  ;;  %v783_v55 = vadd.f32 %v782_v52, %v465_v47 }
 0x230   :  { %v784_v60 = vpop.f32.mrf.mxu1 }
 0x231   :  { %851 = vst [vmem:[#allocation12 + $0x1d0] sm:$0xff] %v783_v55  ;;  %v785_v62 = vadd.f32 %v784_v60, %v466_v54 }
 0x232   :  { %v788_v61 = vpop.f32.mrf.mxu1 }
 0x233   :  { %852 = vst [vmem:[#allocation12 + $0x1d8] sm:$0xff] %v785_v62  ;;  %v789_v3 = vadd.f32 %v788_v61, %v469_v57 }
 0x234   :  { %v790_v5 = vpop.f32.mrf.mxu1 }
 0x235   :  { %855 = vst [vmem:[#allocation12 + $0x1f0] sm:$0xff] %v789_v3  ;;  %v791_v0 = vadd.f32 %v790_v5, %v470_v63 }
 0x237   :  { %856 = vst [vmem:[#allocation12 + $0x1f8] sm:$0xff] %v791_v0 }
 0x238   :  { %1156 = shalt.err (!%p1153_p6)
}
 0x239   :  { %880 = dma.vmem_to_hbm [thread:$0]  %s875_s29, 8192, %s1477_s7, [#allocation13], %s1179_s11, %s1179_s11, %s1180_s12  }
 0x23a   :  { %1171 = dma.done.wait [#allocation4], 2048  }
 0x23b   :  { %1172 = vsyncadd [#allocation4], 4294965248 }
 0x23c   :  { %1173 = dma.done.wait [#allocation13], 8192  }
 0x23d   :  { %1174 = vsyncadd [#allocation13], 4294959104 }
 0x23e   :  { %887 = vsyncpa [#allocation3], 1 }
 0x23f   :  { %888 = vsyncpa [#allocation6], 1 }
 0x240   :  { %889 = vsyncpa [#allocation9], 1 }
 0x241   :  { %890 = vsyncpa [#allocation4], 1 }
 0x242   :  { %891 = vsyncpa [#allocation13], 1 }

</bundles_post_ra>
